<compile_context>
chip_gen: v6e
topology: v6e:2x2x1
jax: 0.10.0
libtpu: 0.0.40
codegen_flags: <defaults>
</compile_context>

<pallas_src>
import jax
import jax.numpy as jnp
from jax.experimental import pallas as pl
from jax.experimental.pallas import tpu as pltpu

_EPS = 1e-12   # torch.nn.functional.normalize default eps
_C = 7         # 3 (approach) + 2 (beta) + 1 (dist) + 1 (width)


def _gripper_kernel(x_ref, o_ref):
    # Native-layout tile: (tile_rows, 7). Rows on sublanes, the 7 channels on lanes.
    x = x_ref[...]
    xf = x.astype(jnp.float32)  # no-op when the input is already f32

    a = xf[:, 0:3]              # approach
    b = xf[:, 3:5]              # beta

    # Per-row squared norms of each group (3-wide / 2-wide lane reductions).
    a_sumsq = jnp.sum(a * a, axis=1, keepdims=True)          # (tile_rows, 1)
    b_sumsq = jnp.sum(b * b, axis=1, keepdims=True)          # (tile_rows, 1)

    # x * rsqrt(max(sumsq, eps^2))  ==  x / max(||x||, eps)   (EUP rsqrt, no divides)
    inv_a = jax.lax.rsqrt(jnp.maximum(a_sumsq, _EPS * _EPS))
    inv_b = jax.lax.rsqrt(jnp.maximum(b_sumsq, _EPS * _EPS))

    # Channel-sliced stores; pass-through channels skip both the multiply and
    # the f32 round trip.
    o_ref[:, 0:3] = (a * inv_a).astype(o_ref.dtype)
    o_ref[:, 3:5] = (b * inv_b).astype(o_ref.dtype)
    o_ref[:, 5:7] = x[:, 5:7]


def _pick_tile_rows():
    """Chip-gated batch tile.  Keep 2 arrays x 2 pipeline buffers of
    128-lane-padded f32 rows (512 B/row each) under ~1/8 of physical VMEM so the
    default scoped-VMEM limit is respected on v5e/v6e (128 MiB) and v7x (64 MiB).
    """
    try:
        vmem_bytes = pltpu.get_tpu_info().vmem_capacity_bytes
    except Exception:
        vmem_bytes = 64 * 1024 * 1024  # conservative (v7x-sized) fallback
    budget = vmem_bytes // 8
    tile = budget // (4 * 128 * 4)     # 4 buffers, 128 lanes, 4 B/elem
    return max(1024, min(8192, (tile // 8) * 8))


def _fused_normalize(x):
    """Small-batch fast path: single fused pure-JAX elementwise op."""
    xf = x.astype(jnp.float32)
    a = xf[:, 0:3]
    b = xf[:, 3:5]
    inv_a = jax.lax.rsqrt(jnp.maximum(jnp.sum(a * a, axis=1, keepdims=True), _EPS * _EPS))
    inv_b = jax.lax.rsqrt(jnp.maximum(jnp.sum(b * b, axis=1, keepdims=True), _EPS * _EPS))
    return jnp.concatenate(
        [(a * inv_a).astype(x.dtype), (b * inv_b).astype(x.dtype), x[:, 5:7]], axis=1)


def gripper_grasp_regressor2(x, *, tile_rows=None, min_pallas_rows=1024,
                             force_pallas=False):
    """x: (B, 7) array. Returns (B, 7) with normalized approach/beta channels.

    Works directly on the native (B, 7) layout: no wrapper transposes, no pad.
    """
    B, C = x.shape
    assert C == _C, f"expected {_C} channels, got {C}"

    # Below ~1K rows the kernel launch + pipeline fill dominates; use the fused
    # pure-JAX path (identical math) unless the caller forces the kernel.
    if not force_pallas and B < min_pallas_rows:
        return _fused_normalize(x)

    if tile_rows is None:
        tile_rows = _pick_tile_rows()
    # Sublane-align and never make the block (much) larger than the batch.
    rows8 = pl.cdiv(B, 8) * 8
    tile_rows = max(8, (min(tile_rows, rows8) // 8) * 8)

    grid = (pl.cdiv(B, tile_rows),)  # ragged last block handled by Pallas

    return pl.pallas_call(
        _gripper_kernel,
        out_shape=jax.ShapeDtypeStruct((B, _C), x.dtype),
        grid_spec=pl.GridSpec(
            grid=grid,
            in_specs=[pl.BlockSpec((tile_rows, _C), lambda i: (i, 0))],
            out_specs=pl.BlockSpec((tile_rows, _C), lambda i: (i, 0)),
        ),
        compiler_params=pltpu.CompilerParams(
            dimension_semantics=("parallel",),   # lets v7x shard when grid >= 2
        ),
    )(x)


def _reference(x):
    """Pure-JAX reference matching the PyTorch forward (norm + clamped divide)."""
    approach = x[:, 0:3]
    approach = approach / jnp.maximum(
        jnp.linalg.norm(approach, axis=1, keepdims=True), _EPS)
    beta = x[:, 3:5]
    beta = beta / jnp.maximum(
        jnp.linalg.norm(beta, axis=1, keepdims=True), _EPS)
    return jnp.concatenate([approach, beta, x[:, 5:6], x[:, 6:7]], axis=1)


if __name__ == "__main__":
    key = jax.random.PRNGKey(0)

    # Small shape consistent with the module: (batch, 7) grasp-regression rows.
    # B deliberately not a multiple of the tile -> exercises the ragged last block.
    B = 1237
    x = jax.random.normal(key, (B, _C), dtype=jnp.float32)

    # Pallas path: small tile -> multi-block grid + ragged last block.
    out = gripper_grasp_regressor2(x, tile_rows=512, force_pallas=True)
    out = jax.block_until_ready(out)

    ref = _reference(x)
    assert out.shape == (B, _C)
    assert jnp.allclose(out, ref, atol=1e-5, rtol=1e-5), "pallas kernel mismatch vs reference"

    # Small-batch fast path (pure fused JAX) matches too.
    x_small = x[:5]
    out_small = jax.block_until_ready(gripper_grasp_regressor2(x_small))
    assert jnp.allclose(out_small, _reference(x_small), atol=1e-5, rtol=1e-5), \
        "fast path mismatch vs reference"

    print("KERNEL_OK")
</pallas_src>

<mosaic_0001>
module attributes {stable_mosaic.version = 11 : i64} {
  func.func @_gripper_kernel(%arg0: i32, %arg1: memref<512x7xf32, #tpu.memory_space<vmem>>, %arg2: memref<512x7xf32, #tpu.memory_space<vmem>>) attributes {dimension_semantics = [#tpu.dimension_semantics<parallel>], iteration_bounds = array<i64: 3>, scalar_prefetch = 0 : i64, scratch_operands = 0 : i64, tpu.core_type = #tpu.core_type<tc>, window_params = [{transform_indices = @transform_0, window_bounds = array<i64: 512, 7>}, {transform_indices = @transform_1, window_bounds = array<i64: 512, 7>}]} {
    %c0 = arith.constant 0 : index
    %c0_0 = arith.constant 0 : index
    %0 = vector.load %arg1[%c0, %c0_0] : memref<512x7xf32, #tpu.memory_space<vmem>>, vector<512x7xf32>
    %1 = vector.extract_strided_slice %0 {offsets = [0, 0], sizes = [512, 3], strides = [1, 1]} : vector<512x7xf32> to vector<512x3xf32>
    %2 = vector.extract_strided_slice %0 {offsets = [0, 3], sizes = [512, 2], strides = [1, 1]} : vector<512x7xf32> to vector<512x2xf32>
    %3 = arith.mulf %1, %1 : vector<512x3xf32>
    %cst = arith.constant dense<0.000000e+00> : vector<512xf32>
    %4 = vector.multi_reduction <add>, %3, %cst [1] : vector<512x3xf32> to vector<512xf32>
    %5 = vector.shape_cast %4 : vector<512xf32> to vector<512x1xf32>
    %6 = arith.mulf %2, %2 : vector<512x2xf32>
    %cst_1 = arith.constant dense<0.000000e+00> : vector<512xf32>
    %7 = vector.multi_reduction <add>, %6, %cst_1 [1] : vector<512x2xf32> to vector<512xf32>
    %8 = vector.shape_cast %7 : vector<512xf32> to vector<512x1xf32>
    %cst_2 = arith.constant 1.000000e-24 : f32
    %9 = vector.broadcast %cst_2 : f32 to vector<512x1xf32>
    %10 = arith.maximumf %5, %9 : vector<512x1xf32>
    %11 = math.rsqrt %10 : vector<512x1xf32>
    %cst_3 = arith.constant 1.000000e-24 : f32
    %12 = vector.broadcast %cst_3 : f32 to vector<512x1xf32>
    %13 = arith.maximumf %8, %12 : vector<512x1xf32>
    %14 = math.rsqrt %13 : vector<512x1xf32>
    %15 = vector.broadcast %11 : vector<512x1xf32> to vector<512x3xf32>
    %16 = arith.mulf %1, %15 : vector<512x3xf32>
    %c0_4 = arith.constant 0 : index
    %c0_5 = arith.constant 0 : index
    %17 = vector.load %arg2[%c0_4, %c0_5] : memref<512x7xf32, #tpu.memory_space<vmem>>, vector<512x3xf32>
    tpu.vector_store %arg2[%c0_4, %c0_5], %16 {strides = array<i32>} : memref<512x7xf32, #tpu.memory_space<vmem>>, vector<512x3xf32>,
    %18 = vector.broadcast %14 : vector<512x1xf32> to vector<512x2xf32>
    %19 = arith.mulf %2, %18 : vector<512x2xf32>
    %c0_6 = arith.constant 0 : index
    %c3 = arith.constant 3 : index
    %20 = vector.load %arg2[%c0_6, %c3] : memref<512x7xf32, #tpu.memory_space<vmem>>, vector<512x2xf32>
    tpu.vector_store %arg2[%c0_6, %c3], %19 {strides = array<i32>} : memref<512x7xf32, #tpu.memory_space<vmem>>, vector<512x2xf32>,
    %21 = vector.extract_strided_slice %0 {offsets = [0, 5], sizes = [512, 2], strides = [1, 1]} : vector<512x7xf32> to vector<512x2xf32>
    %c0_7 = arith.constant 0 : index
    %c5 = arith.constant 5 : index
    %22 = vector.load %arg2[%c0_7, %c5] : memref<512x7xf32, #tpu.memory_space<vmem>>, vector<512x2xf32>
    tpu.vector_store %arg2[%c0_7, %c5], %21 {strides = array<i32>} : memref<512x7xf32, #tpu.memory_space<vmem>>, vector<512x2xf32>,
    return
  }
  func.func @transform_0(%arg0: i32) -> (i32, i32) {
    %c0_i32 = arith.constant 0 : i32
    %c0_i32_0 = arith.constant 0 : i32
    return %arg0, %c0_i32 : i32, i32
  }
  func.func @transform_1(%arg0: i32) -> (i32, i32) {
    %c0_i32 = arith.constant 0 : i32
    %c0_i32_0 = arith.constant 0 : i32
    return %arg0, %c0_i32 : i32, i32
  }
}

</mosaic_0001>

<bundles_post_ra>
// kernel: tpu_custom_call.1
= control target key start
LH: loop header
LB: loop body
LE: loop exit
PB: predicated region body
PF: predicated region fallthrough
CT: control target
= control target key end

     0   :  { %s2489_s6 = smov 0   ;;  %s2491_s7 = smov 0   ;;  %s4017_s0 = inlined_call_operand.vmem [shape: f32[1237,7], index: 0, kind: input, shape index: {}]   ;;  %s4018_s1 = inlined_call_operand.vmem [shape: f32[1237,7], index: 1, kind: output, shape index: {}]  }
   0x1   :  { %s2493_s8 = smov 0  }
   0x2 LB: > { %s2502_s9 = sadd.s32 4294967295, %s2444_s8   ;;  %s2504_s10 = sadd.s32 1, %s2444_s8   ;;  %s2444_s8 = sphi %s2493_s8, %s4252_s8   ;;  %s2440_s7 = sphi %s2491_s7, %s4251_s7   ;;  %s2436_s6 = sphi %s2489_s6, %s4250_s6  }
   0x3   : > { %s41_s11 = ssub.s32 %s2444_s8, %s2504_s10  ;;  %s44_s12 = sadd.s32 1, %s2440_s7 }
   0x4   : > { %p42_p0 = scmp.eq.s32.totalorder %s41_s11, 0  ;;  %p54_p1 = scmp.ne.s32.totalorder %s2440_s7, %s2436_s6 }
   0x5   : > { %p55_p2 = scmp.eq.s32.totalorder %s2502_s9, 2  ;;  %p1957_p3 = scmp.ge.s32.totalorder %s2444_s8, 1 }
   0x6   : > { %s2512_s13 = scalar_select %p42_p0, %s2440_s7, %s44_s12  }
   0x7   : > { %p2514_p4 = por %p55_p2, %p54_p1  ;;  %p96_p5 = scmp.lt.s32.totalorder %s2444_s8, 4 }
   0x9   : > { %p97_p6 = pnand %p1957_p3, %p96_p5 }
   0xb   : > { %100 = sbr.rel (%p97_p6) target bundleno = 676 (0x2a4), region = 24 }
  0x10   : > { %s2519_s15 = sshll.u32 %s2502_s9, 6  ;;  %vm266_vm0 = vcmask 23552   ;;  %s2478_s21 = smov 125   ;;  %vm715_vm1 = vcmask 15360   ;;  %vm1356_vm2 = vcmask 39960   ;;  %vm1421_vm3 = vcmask 56360  }
  0x11   : > { %p124_p7 = scmp.lt.s32.totalorder %s2519_s15, 154  ;;  %s116_s22 = sand.u32 1, %s2436_s6  }
  0x12   : > { %s1958_s23 = sshll.u32 %s116_s22, 9  ;;  %s1494_s25 = ssub.s32 (%p2514_p4), 155, %s2519_s15 }
  0x13   : > { %s125_s16 = scalar_select %p124_p7, %s2519_s15, 154 }
  0x14   : > { %s3121_s24 = scalar_lea.vmem [#allocation2], %s1958_s23   ;;  %s1978_s26 = sshll.u32 (%p2514_p4), %s2502_s9, 9 }
  0x15   : > { %s1960_s17 = sshll.u32 %s125_s16, 3  ;;  %p1495_p8 = scmp.lt.s32.totalorder (%p2514_p4), %s1494_s25, 64 }
  0x16   : > { %s2526_s20 = scalar_lea.vmem %s4017_s0, %s1960_s17  ;;  %s3818_s29 = scalar_lea.vmem (%p2514_p4), %s4018_s1, %s1978_s26  }
  0x17   : > { %v2529_v0 = vld [vmem:[%s2526_s20 + $0x10] sm:$0xff]  ;;  %v2532_v1 = vld [vmem:[%s2526_s20] sm:$0xff]  ;;  %v2535_v2 = vld [vmem:[%s2526_s20 + $0x18] sm:$0xff] }
  0x18   : > { %v2539_v3 = vmul.f32 %v2529_v0, %v2529_v0  ;;  %v2543_v4 = vmul.f32 %v2532_v1, %v2532_v1  ;;  %v2547_v5 = vmul.f32 %v2535_v2, %v2535_v2  ;;  %v2550_v6 = vld [vmem:[%s2526_s20 + $0x8] sm:$0xff]  ;;  %v2560_v9 = vld [vmem:[%s2526_s20 + $0x20] sm:$0xff]  ;;  %v2579_v16 = vld [vmem:[%s2526_s20 + $0x38] sm:$0xff] }
  0x19   : > { %v2554_v7 = vmul.f32 %v2550_v6, %v2550_v6  ;;  %v2557_v8 = vld [vmem:[%s2526_s20 + $0x28] sm:$0xff]  ;;  %v2576_v15 = vmul.f32 %v2560_v9, %v2560_v9  ;;  %v2582_v17 = vld [vmem:[%s2526_s20 + $0x30] sm:$0xff]  ;;  %v2590_v20 = vmul.f32 %v2579_v16, %v2579_v16  ;;  %v2600_v23 = vld [vmem:[%s2526_s20 + $0x40] sm:$0xff] }
  0x1a   : > { %v273_v10 = vsel %vm266_vm0, %v2539_v3, 0.0  ;;  %v267_v11 = vsel %vm266_vm0, %v2543_v4, 0.0  ;;  %v276_v12 = vsel %vm266_vm0, %v2547_v5, 0.0  ;;  %v2572_v14 = vmul.f32 %v2557_v8, %v2557_v8  ;;  %v2597_v22 = vld [vmem:[%s2526_s20 + $0x48] sm:$0xff]  ;;  %v2615_v28 = vld [vmem:[%s2526_s20 + $0x58] sm:$0xff]  ;;  %v2618_v29 = vld [vmem:[%s2526_s20 + $0x50] sm:$0xff] }
  0x1b   : > { %274 = vadd.xlane.f32.xlu1 %v273_v10  ;;  %268 = vadd.xlane.f32.xlu0 %v267_v11  ;;  %v270_v13 = vsel %vm266_vm0, %v2554_v7, 0.0  ;;  %v279_v19 = vsel %vm266_vm0, %v2576_v15, 0.0  ;;  %v2594_v21 = vmul.f32 %v2582_v17, %v2582_v17  ;;  %v288_v24 = vsel %vm266_vm0, %v2590_v20, 0.0  ;;  %v2633_v34 = vld [vmem:[%s2526_s20 + $0x68] sm:$0xff]  ;;  %v2636_v35 = vld [vmem:[%s2526_s20 + $0x60] sm:$0xff]  ;;  %v2651_v40 = vld [vmem:[%s2526_s20 + $0x78] sm:$0xff] }
  0x1c   : > { %v282_v18 = vsel %vm266_vm0, %v2572_v14, 0.0  ;;  %v2608_v26 = vmul.f32 %v2597_v22, %v2597_v22  ;;  %v2612_v27 = vmul.f32 %v2600_v23, %v2600_v23  ;;  %v2626_v32 = vmul.f32 %v2615_v28, %v2615_v28  ;;  %v2654_v41 = vld [vmem:[%s2526_s20 + $0x70] sm:$0xff]  ;;  %v2669_v46 = vld [vmem:[%s2526_s20 + $0x88] sm:$0xff]  ;;  %v2672_v47 = vld [vmem:[%s2526_s20 + $0x80] sm:$0xff] }
  0x1d   : > { %v285_v25 = vsel %vm266_vm0, %v2594_v21, 0.0  ;;  %v2630_v33 = vmul.f32 %v2618_v29, %v2618_v29  ;;  %v2644_v38 = vmul.f32 %v2633_v34, %v2633_v34  ;;  %v2648_v39 = vmul.f32 %v2636_v35, %v2636_v35  ;;  %v2687_v52 = vld [vmem:[%s2526_s20 + $0x98] sm:$0xff]  ;;  %v2690_v53 = vld [vmem:[%s2526_s20 + $0x90] sm:$0xff]  ;;  %v2705_v58 = vld [vmem:[%s2526_s20 + $0xa8] sm:$0xff] }
  0x1e   : > { %v294_v30 = vsel %vm266_vm0, %v2608_v26, 0.0  ;;  %v291_v31 = vsel %vm266_vm0, %v2612_v27, 0.0  ;;  %v300_v36 = vsel %vm266_vm0, %v2626_v32, 0.0  ;;  %v2662_v44 = vmul.f32 %v2651_v40, %v2651_v40  ;;  %v2708_v59 = vld [vmem:[%s2526_s20 + $0xa0] sm:$0xff]  ;;  %v2723_v10 = vld [vmem:[%s2526_s20 + $0xb8] sm:$0xff]  ;;  %v2726_v11 = vld [vmem:[%s2526_s20 + $0xb0] sm:$0xff] }
  0x1f   : > { %277 = vadd.xlane.f32.xlu1 %v276_v12  ;;  %271 = vadd.xlane.f32.xlu0 %v270_v13  ;;  %v297_v37 = vsel %vm266_vm0, %v2630_v33, 0.0  ;;  %v306_v42 = vsel %vm266_vm0, %v2644_v38, 0.0  ;;  %v303_v43 = vsel %vm266_vm0, %v2648_v39, 0.0  ;;  %v2666_v45 = vmul.f32 %v2654_v41, %v2654_v41  ;;  %4095 = vst [vmem:[#allocation3_spill] sm:$0xff] %v2726_v11 }
  0x20   : > { %v312_v48 = vsel %vm266_vm0, %v2662_v44, 0.0  ;;  %v2680_v50 = vmul.f32 %v2669_v46, %v2669_v46  ;;  %v2684_v51 = vmul.f32 %v2672_v47, %v2672_v47  ;;  %v2698_v56 = vmul.f32 %v2687_v52, %v2687_v52 }
  0x21   : > { %v309_v49 = vsel %vm266_vm0, %v2666_v45, 0.0  ;;  %v2702_v57 = vmul.f32 %v2690_v53, %v2690_v53  ;;  %v2716_v62 = vmul.f32 %v2705_v58, %v2705_v58  ;;  %v2720_v63 = vmul.f32 %v2708_v59, %v2708_v59 }
  0x22   : > { %v318_v54 = vsel %vm266_vm0, %v2680_v50, 0.0  ;;  %v315_v55 = vsel %vm266_vm0, %v2684_v51, 0.0  ;;  %v324_v60 = vsel %vm266_vm0, %v2698_v56, 0.0 }
  0x23   : > { %283 = vadd.xlane.f32.xlu1 %v282_v18  ;;  %280 = vadd.xlane.f32.xlu0 %v279_v19  ;;  %v321_v61 = vsel %vm266_vm0, %v2702_v57, 0.0  ;;  %v330_v12 = vsel %vm266_vm0, %v2716_v62, 0.0  ;;  %v327_v13 = vsel %vm266_vm0, %v2720_v63, 0.0  ;;  %v2734_v18 = vmul.f32 %v2723_v10, %v2723_v10 }
  0x24   : > { %v2738_v19 = vmul.f32 %v2726_v11, %v2726_v11  ;;  %v2834_v11 = vld [vmem:[%s2526_s20 + $0x110] sm:$0xff] }
  0x25   : > { %4112 = vst [vmem:[#allocation20_spill] sm:$0xff] %v2834_v11 }
  0x27   : > { %289 = vadd.xlane.f32.xlu1 %v288_v24  ;;  %286 = vadd.xlane.f32.xlu0 %v285_v25  ;;  %v2741_v24 = vld [vmem:[%s2526_s20 + $0xc8] sm:$0xff]  ;;  %v2744_v25 = vld [vmem:[%s2526_s20 + $0xc0] sm:$0xff] }
  0x28   : > { %4096 = vst [vmem:[#allocation4_spill] sm:$0xff] %v2741_v24  ;;  %4097 = vst [vmem:[#allocation5_spill] sm:$0xff] %v2744_v25 }
  0x2b   : > { %295 = vadd.xlane.f32.xlu1 %v294_v30  ;;  %292 = vadd.xlane.f32.xlu0 %v291_v31  ;;  %v336_v30 = vsel %vm266_vm0, %v2734_v18, 0.0  ;;  %v333_v31 = vsel %vm266_vm0, %v2738_v19, 0.0 }
  0x2f   : > { %301 = vadd.xlane.f32.xlu1 %v300_v36  ;;  %298 = vadd.xlane.f32.xlu0 %v297_v37  ;;  %v2752_v36 = vmul.f32 %v2741_v24, %v2741_v24  ;;  %v2756_v37 = vmul.f32 %v2744_v25, %v2744_v25  ;;  %v2813_v25 = vld [vmem:[%s2526_s20 + $0x108] sm:$0xff]  ;;  %v2816_v24 = vld [vmem:[%s2526_s20 + $0x100] sm:$0xff] }
  0x30   : > { %4107 = vst [vmem:[#allocation15_spill] sm:$0xff] %v2813_v25  ;;  %4108 = vst [vmem:[#allocation16_spill] sm:$0xff] %v2816_v24 }
  0x33   : > { %307 = vadd.xlane.f32.xlu1 %v306_v42  ;;  %304 = vadd.xlane.f32.xlu0 %v303_v43  ;;  %v2759_v42 = vld [vmem:[%s2526_s20 + $0xd8] sm:$0xff]  ;;  %v2762_v43 = vld [vmem:[%s2526_s20 + $0xd0] sm:$0xff] }
  0x34   : > { %4098 = vst [vmem:[#allocation6_spill] sm:$0xff] %v2759_v42  ;;  %4099 = vst [vmem:[#allocation7_spill] sm:$0xff] %v2762_v43 }
  0x37   : > { %313 = vadd.xlane.f32.xlu1 %v312_v48  ;;  %310 = vadd.xlane.f32.xlu0 %v309_v49  ;;  %v342_v48 = vsel %vm266_vm0, %v2752_v36, 0.0  ;;  %v339_v49 = vsel %vm266_vm0, %v2756_v37, 0.0 }
  0x3b   : > { %319 = vadd.xlane.f32.xlu1 %v318_v54  ;;  %316 = vadd.xlane.f32.xlu0 %v315_v55  ;;  %v2770_v54 = vmul.f32 %v2759_v42, %v2759_v42  ;;  %v2774_v55 = vmul.f32 %v2762_v43, %v2762_v43  ;;  %v2795_v43 = vld [vmem:[%s2526_s20 + $0xf8] sm:$0xff]  ;;  %v2798_v42 = vld [vmem:[%s2526_s20 + $0xf0] sm:$0xff] }
  0x3c   : > { %4103 = vst [vmem:[#allocation11_spill] sm:$0xff] %v2795_v43  ;;  %4104 = vst [vmem:[#allocation12_spill] sm:$0xff] %v2798_v42 }
  0x3f   : > { %325 = vadd.xlane.f32.xlu1 %v324_v60  ;;  %322 = vadd.xlane.f32.xlu0 %v321_v61  ;;  %v2777_v60 = vld [vmem:[%s2526_s20 + $0xe8] sm:$0xff]  ;;  %v2780_v61 = vld [vmem:[%s2526_s20 + $0xe0] sm:$0xff] }
  0x40   : > { %4100 = vst [vmem:[#allocation8_spill] sm:$0xff] %v2777_v60  ;;  %4101 = vst [vmem:[#allocation9_spill] sm:$0xff] %v2780_v61 }
  0x43   : > { %331 = vadd.xlane.f32.xlu1 %v330_v12  ;;  %328 = vadd.xlane.f32.xlu0 %v327_v13  ;;  %v348_v12 = vsel %vm266_vm0, %v2770_v54, 0.0  ;;  %v345_v13 = vsel %vm266_vm0, %v2774_v55, 0.0 }
  0x47   : > { %337 = vadd.xlane.f32.xlu1 %v336_v30  ;;  %334 = vadd.xlane.f32.xlu0 %v333_v31  ;;  %v2788_v30 = vmul.f32 %v2777_v60, %v2777_v60  ;;  %v2792_v31 = vmul.f32 %v2780_v61, %v2780_v61  ;;  %v2806_v60 = vmul.f32 %v2795_v43, %v2795_v43 }
  0x48   : > { %v2810_v61 = vmul.f32 %v2798_v42, %v2798_v42  ;;  %v2824_v43 = vmul.f32 %v2813_v25, %v2813_v25  ;;  %v2828_v42 = vmul.f32 %v2816_v24, %v2816_v24  ;;  %v2846_v24 = vmul.f32 %v2834_v11, %v2834_v11 }
  0x49   : > { %4102 = vst [vmem:[#allocation10_spill] sm:$0xff] %v2788_v30  ;;  %4105 = vst [vmem:[#allocation13_spill] sm:$0xff] %v2806_v60 }
  0x4a   : > { %4106 = vst [vmem:[#allocation14_spill] sm:$0xff] %v2810_v61  ;;  %4109 = vst [vmem:[#allocation17_spill] sm:$0xff] %v2824_v43 }
  0x4b   : > { %343 = vadd.xlane.f32.xlu1 %v342_v48  ;;  %340 = vadd.xlane.f32.xlu0 %v339_v49  ;;  %v354_v48 = vsel %vm266_vm0, %v2788_v30, 0.0  ;;  %v351_v49 = vsel %vm266_vm0, %v2792_v31, 0.0  ;;  %4110 = vst [vmem:[#allocation18_spill] sm:$0xff] %v2828_v42  ;;  %v2831_v30 = vld [vmem:[%s2526_s20 + $0x118] sm:$0xff]  ;;  %4114 = vst [vmem:[#allocation22_spill] sm:$0xff] %v2846_v24 }
  0x4c   : > { %4111 = vst [vmem:[#allocation19_spill] sm:$0xff] %v2831_v30  ;;  %v2842_v25 = vmul.f32 %v2831_v30, %v2831_v30 }
  0x4e   : > { %4113 = vst [vmem:[#allocation21_spill] sm:$0xff] %v2842_v25 }
  0x4f   : > { %349 = vadd.xlane.f32.xlu1 %v348_v12  ;;  %346 = vadd.xlane.f32.xlu0 %v345_v13  ;;  %v360_v12 = vsel %vm266_vm0, %v2806_v60, 0.0  ;;  %v357_v13 = vsel %vm266_vm0, %v2810_v61, 0.0  ;;  %v2849_v60 = vld [vmem:[%s2526_s20 + $0x128] sm:$0xff]  ;;  %v2852_v61 = vld [vmem:[%s2526_s20 + $0x120] sm:$0xff] }
  0x50   : > { %4115 = vst [vmem:[#allocation23_spill] sm:$0xff] %v2849_v60  ;;  %4116 = vst [vmem:[#allocation24_spill] sm:$0xff] %v2852_v61  ;;  %v2860_v30 = vmul.f32 %v2849_v60, %v2849_v60  ;;  %v2864_v11 = vmul.f32 %v2852_v61, %v2852_v61 }
  0x52   : > { %4117 = vst [vmem:[#allocation25_spill] sm:$0xff] %v2860_v30  ;;  %4118 = vst [vmem:[#allocation26_spill] sm:$0xff] %v2864_v11 }
  0x53   : > { %355 = vadd.xlane.f32.xlu1 %v354_v48  ;;  %352 = vadd.xlane.f32.xlu0 %v351_v49  ;;  %v366_v48 = vsel %vm266_vm0, %v2824_v43, 0.0  ;;  %v363_v49 = vsel %vm266_vm0, %v2828_v42, 0.0  ;;  %v2867_v43 = vld [vmem:[%s2526_s20 + $0x138] sm:$0xff]  ;;  %v2870_v42 = vld [vmem:[%s2526_s20 + $0x130] sm:$0xff] }
  0x54   : > { %4119 = vst [vmem:[#allocation27_spill] sm:$0xff] %v2867_v43  ;;  %4120 = vst [vmem:[#allocation28_spill] sm:$0xff] %v2870_v42  ;;  %v2878_v60 = vmul.f32 %v2867_v43, %v2867_v43  ;;  %v2882_v61 = vmul.f32 %v2870_v42, %v2870_v42 }
  0x56   : > { %4121 = vst [vmem:[#allocation29_spill] sm:$0xff] %v2878_v60  ;;  %4122 = vst [vmem:[#allocation30_spill] sm:$0xff] %v2882_v61 }
  0x57   : > { %361 = vadd.xlane.f32.xlu1 %v360_v12  ;;  %358 = vadd.xlane.f32.xlu0 %v357_v13  ;;  %v372_v12 = vsel %vm266_vm0, %v2842_v25, 0.0  ;;  %v369_v13 = vsel %vm266_vm0, %v2846_v24, 0.0  ;;  %v2885_v25 = vld [vmem:[%s2526_s20 + $0x148] sm:$0xff]  ;;  %v2888_v24 = vld [vmem:[%s2526_s20 + $0x140] sm:$0xff] }
  0x58   : > { %4123 = vst [vmem:[#allocation31_spill] sm:$0xff] %v2885_v25  ;;  %4124 = vst [vmem:[#allocation32_spill] sm:$0xff] %v2888_v24  ;;  %v2896_v43 = vmul.f32 %v2885_v25, %v2885_v25  ;;  %v2900_v42 = vmul.f32 %v2888_v24, %v2888_v24 }
  0x5a   : > { %4125 = vst [vmem:[#allocation33_spill] sm:$0xff] %v2896_v43  ;;  %4126 = vst [vmem:[#allocation34_spill] sm:$0xff] %v2900_v42 }
  0x5b   : > { %367 = vadd.xlane.f32.xlu1 %v366_v48  ;;  %364 = vadd.xlane.f32.xlu0 %v363_v49  ;;  %v378_v48 = vsel %vm266_vm0, %v2860_v30, 0.0  ;;  %v375_v49 = vsel %vm266_vm0, %v2864_v11, 0.0  ;;  %v2903_v30 = vld [vmem:[%s2526_s20 + $0x158] sm:$0xff]  ;;  %v2906_v11 = vld [vmem:[%s2526_s20 + $0x150] sm:$0xff] }
  0x5c   : > { %4127 = vst [vmem:[#allocation35_spill] sm:$0xff] %v2903_v30  ;;  %4128 = vst [vmem:[#allocation36_spill] sm:$0xff] %v2906_v11  ;;  %v2914_v25 = vmul.f32 %v2903_v30, %v2903_v30  ;;  %v2918_v24 = vmul.f32 %v2906_v11, %v2906_v11 }
  0x5e   : > { %4129 = vst [vmem:[#allocation37_spill] sm:$0xff] %v2914_v25  ;;  %4130 = vst [vmem:[#allocation38_spill] sm:$0xff] %v2918_v24 }
  0x5f   : > { %373 = vadd.xlane.f32.xlu1 %v372_v12  ;;  %370 = vadd.xlane.f32.xlu0 %v369_v13  ;;  %v384_v12 = vsel %vm266_vm0, %v2878_v60, 0.0  ;;  %v381_v13 = vsel %vm266_vm0, %v2882_v61, 0.0  ;;  %v2921_v60 = vld [vmem:[%s2526_s20 + $0x168] sm:$0xff]  ;;  %v2924_v61 = vld [vmem:[%s2526_s20 + $0x160] sm:$0xff] }
  0x60   : > { %4131 = vst [vmem:[#allocation39_spill] sm:$0xff] %v2921_v60  ;;  %4132 = vst [vmem:[#allocation40_spill] sm:$0xff] %v2924_v61  ;;  %v2932_v30 = vmul.f32 %v2921_v60, %v2921_v60  ;;  %v2936_v11 = vmul.f32 %v2924_v61, %v2924_v61 }
  0x62   : > { %4133 = vst [vmem:[#allocation41_spill] sm:$0xff] %v2932_v30  ;;  %4134 = vst [vmem:[#allocation42_spill] sm:$0xff] %v2936_v11 }
  0x63   : > { %379 = vadd.xlane.f32.xlu1 %v378_v48  ;;  %376 = vadd.xlane.f32.xlu0 %v375_v49  ;;  %v390_v48 = vsel %vm266_vm0, %v2896_v43, 0.0  ;;  %v387_v49 = vsel %vm266_vm0, %v2900_v42, 0.0  ;;  %v2939_v43 = vld [vmem:[%s2526_s20 + $0x178] sm:$0xff]  ;;  %v2942_v42 = vld [vmem:[%s2526_s20 + $0x170] sm:$0xff] }
  0x64   : > { %4135 = vst [vmem:[#allocation43_spill] sm:$0xff] %v2939_v43  ;;  %4136 = vst [vmem:[#allocation44_spill] sm:$0xff] %v2942_v42  ;;  %v2950_v60 = vmul.f32 %v2939_v43, %v2939_v43  ;;  %v2954_v61 = vmul.f32 %v2942_v42, %v2942_v42 }
  0x66   : > { %4137 = vst [vmem:[#allocation45_spill] sm:$0xff] %v2950_v60  ;;  %4138 = vst [vmem:[#allocation46_spill] sm:$0xff] %v2954_v61 }
  0x67   : > { %385 = vadd.xlane.f32.xlu1 %v384_v12  ;;  %382 = vadd.xlane.f32.xlu0 %v381_v13  ;;  %v396_v12 = vsel %vm266_vm0, %v2914_v25, 0.0  ;;  %v393_v13 = vsel %vm266_vm0, %v2918_v24, 0.0  ;;  %v2957_v25 = vld [vmem:[%s2526_s20 + $0x188] sm:$0xff]  ;;  %v2960_v24 = vld [vmem:[%s2526_s20 + $0x180] sm:$0xff] }
  0x68   : > { %4139 = vst [vmem:[#allocation47_spill] sm:$0xff] %v2957_v25  ;;  %4140 = vst [vmem:[#allocation48_spill] sm:$0xff] %v2960_v24  ;;  %v2968_v43 = vmul.f32 %v2957_v25, %v2957_v25  ;;  %v2972_v42 = vmul.f32 %v2960_v24, %v2960_v24 }
  0x6a   : > { %4141 = vst [vmem:[#allocation49_spill] sm:$0xff] %v2968_v43  ;;  %4142 = vst [vmem:[#allocation50_spill] sm:$0xff] %v2972_v42 }
  0x6b   : > { %391 = vadd.xlane.f32.xlu1 %v390_v48  ;;  %388 = vadd.xlane.f32.xlu0 %v387_v49  ;;  %v402_v48 = vsel %vm266_vm0, %v2932_v30, 0.0  ;;  %v399_v49 = vsel %vm266_vm0, %v2936_v11, 0.0  ;;  %v2975_v30 = vld [vmem:[%s2526_s20 + $0x198] sm:$0xff]  ;;  %v2978_v11 = vld [vmem:[%s2526_s20 + $0x190] sm:$0xff] }
  0x6c   : > { %4143 = vst [vmem:[#allocation51_spill] sm:$0xff] %v2975_v30  ;;  %4144 = vst [vmem:[#allocation52_spill] sm:$0xff] %v2978_v11  ;;  %v2986_v25 = vmul.f32 %v2975_v30, %v2975_v30  ;;  %v2990_v24 = vmul.f32 %v2978_v11, %v2978_v11 }
  0x6e   : > { %4145 = vst [vmem:[#allocation53_spill] sm:$0xff] %v2986_v25  ;;  %4146 = vst [vmem:[#allocation54_spill] sm:$0xff] %v2990_v24 }
  0x6f   : > { %397 = vadd.xlane.f32.xlu1 %v396_v12  ;;  %394 = vadd.xlane.f32.xlu0 %v393_v13  ;;  %v408_v12 = vsel %vm266_vm0, %v2950_v60, 0.0  ;;  %v405_v13 = vsel %vm266_vm0, %v2954_v61, 0.0  ;;  %v2993_v60 = vld [vmem:[%s2526_s20 + $0x1a8] sm:$0xff]  ;;  %v2996_v61 = vld [vmem:[%s2526_s20 + $0x1a0] sm:$0xff] }
  0x70   : > { %4147 = vst [vmem:[#allocation55_spill] sm:$0xff] %v2993_v60  ;;  %4148 = vst [vmem:[#allocation56_spill] sm:$0xff] %v2996_v61  ;;  %v3004_v30 = vmul.f32 %v2993_v60, %v2993_v60  ;;  %v3008_v11 = vmul.f32 %v2996_v61, %v2996_v61 }
  0x72   : > { %4149 = vst [vmem:[#allocation57_spill] sm:$0xff] %v3004_v30  ;;  %4150 = vst [vmem:[#allocation58_spill] sm:$0xff] %v3008_v11 }
  0x73   : > { %403 = vadd.xlane.f32.xlu1 %v402_v48  ;;  %400 = vadd.xlane.f32.xlu0 %v399_v49  ;;  %v414_v48 = vsel %vm266_vm0, %v2968_v43, 0.0  ;;  %v411_v49 = vsel %vm266_vm0, %v2972_v42, 0.0  ;;  %v3011_v43 = vld [vmem:[%s2526_s20 + $0x1b8] sm:$0xff]  ;;  %v3014_v42 = vld [vmem:[%s2526_s20 + $0x1b0] sm:$0xff] }
  0x74   : > { %4151 = vst [vmem:[#allocation59_spill] sm:$0xff] %v3011_v43  ;;  %4152 = vst [vmem:[#allocation60_spill] sm:$0xff] %v3014_v42  ;;  %v3022_v60 = vmul.f32 %v3011_v43, %v3011_v43  ;;  %v3026_v61 = vmul.f32 %v3014_v42, %v3014_v42 }
  0x76   : > { %4153 = vst [vmem:[#allocation61_spill] sm:$0xff] %v3022_v60  ;;  %4154 = vst [vmem:[#allocation62_spill] sm:$0xff] %v3026_v61 }
  0x77   : > { %409 = vadd.xlane.f32.xlu1 %v408_v12  ;;  %406 = vadd.xlane.f32.xlu0 %v405_v13  ;;  %v420_v12 = vsel %vm266_vm0, %v2986_v25, 0.0  ;;  %v417_v13 = vsel %vm266_vm0, %v2990_v24, 0.0  ;;  %v3029_v25 = vld [vmem:[%s2526_s20 + $0x1c8] sm:$0xff]  ;;  %v3032_v24 = vld [vmem:[%s2526_s20 + $0x1c0] sm:$0xff] }
  0x78   : > { %4155 = vst [vmem:[#allocation63_spill] sm:$0xff] %v3029_v25  ;;  %4156 = vst [vmem:[#allocation64_spill] sm:$0xff] %v3032_v24  ;;  %v3040_v43 = vmul.f32 %v3029_v25, %v3029_v25  ;;  %v3044_v42 = vmul.f32 %v3032_v24, %v3032_v24 }
  0x7a   : > { %4157 = vst [vmem:[#allocation65_spill] sm:$0xff] %v3040_v43  ;;  %4158 = vst [vmem:[#allocation66_spill] sm:$0xff] %v3044_v42 }
  0x7b   : > { %415 = vadd.xlane.f32.xlu1 %v414_v48  ;;  %412 = vadd.xlane.f32.xlu0 %v411_v49  ;;  %v426_v48 = vsel %vm266_vm0, %v3004_v30, 0.0  ;;  %v423_v49 = vsel %vm266_vm0, %v3008_v11, 0.0  ;;  %v3047_v30 = vld [vmem:[%s2526_s20 + $0x1d8] sm:$0xff]  ;;  %v3050_v11 = vld [vmem:[%s2526_s20 + $0x1d0] sm:$0xff] }
  0x7c   : > { %4159 = vst [vmem:[#allocation67_spill] sm:$0xff] %v3047_v30  ;;  %4160 = vst [vmem:[#allocation68_spill] sm:$0xff] %v3050_v11  ;;  %v3058_v25 = vmul.f32 %v3047_v30, %v3047_v30  ;;  %v3062_v24 = vmul.f32 %v3050_v11, %v3050_v11 }
  0x7e   : > { %4161 = vst [vmem:[#allocation69_spill] sm:$0xff] %v3058_v25  ;;  %4162 = vst [vmem:[#allocation70_spill] sm:$0xff] %v3062_v24 }
  0x7f   : > { %421 = vadd.xlane.f32.xlu1 %v420_v12  ;;  %418 = vadd.xlane.f32.xlu0 %v417_v13  ;;  %v432_v12 = vsel %vm266_vm0, %v3022_v60, 0.0  ;;  %v429_v13 = vsel %vm266_vm0, %v3026_v61, 0.0  ;;  %v3065_v60 = vld [vmem:[%s2526_s20 + $0x1e8] sm:$0xff]  ;;  %v3068_v61 = vld [vmem:[%s2526_s20 + $0x1e0] sm:$0xff] }
  0x80   : > { %4163 = vst [vmem:[#allocation71_spill] sm:$0xff] %v3065_v60  ;;  %4164 = vst [vmem:[#allocation72_spill] sm:$0xff] %v3068_v61  ;;  %v3076_v30 = vmul.f32 %v3065_v60, %v3065_v60  ;;  %v3080_v11 = vmul.f32 %v3068_v61, %v3068_v61 }
  0x82   : > { %4165 = vst [vmem:[#allocation73_spill] sm:$0xff] %v3076_v30  ;;  %4166 = vst [vmem:[#allocation74_spill] sm:$0xff] %v3080_v11 }
  0x83   : > { %427 = vadd.xlane.f32.xlu1 %v426_v48  ;;  %424 = vadd.xlane.f32.xlu0 %v423_v49  ;;  %v438_v48 = vsel %vm266_vm0, %v3040_v43, 0.0  ;;  %v435_v49 = vsel %vm266_vm0, %v3044_v42, 0.0  ;;  %v3083_v43 = vld [vmem:[%s2526_s20 + $0x1f8] sm:$0xff]  ;;  %v3086_v42 = vld [vmem:[%s2526_s20 + $0x1f0] sm:$0xff] }
  0x84   : > { %4167 = vst [vmem:[#allocation75_spill] sm:$0xff] %v3083_v43  ;;  %4168 = vst [vmem:[#allocation76_spill] sm:$0xff] %v3086_v42  ;;  %v3094_v60 = vmul.f32 %v3083_v43, %v3083_v43  ;;  %v3098_v61 = vmul.f32 %v3086_v42, %v3086_v42 }
  0x86   : > { %4169 = vst [vmem:[#allocation77_spill] sm:$0xff] %v3094_v60 }
  0x87   : > { %433 = vadd.xlane.f32.xlu1 %v432_v12  ;;  %430 = vadd.xlane.f32.xlu0 %v429_v13  ;;  %v444_v12 = vsel %vm266_vm0, %v3058_v25, 0.0  ;;  %v441_v13 = vsel %vm266_vm0, %v3062_v24, 0.0 }
  0x8b   : > { %439 = vadd.xlane.f32.xlu1 %v438_v48  ;;  %436 = vadd.xlane.f32.xlu0 %v435_v49  ;;  %v450_v48 = vsel %vm266_vm0, %v3076_v30, 0.0  ;;  %v447_v49 = vsel %vm266_vm0, %v3080_v11, 0.0 }
  0x8f   : > { %445 = vadd.xlane.f32.xlu1 %v444_v12  ;;  %442 = vadd.xlane.f32.xlu0 %v441_v13  ;;  %v456_v12 = vsel %vm266_vm0, %v3094_v60, 0.0  ;;  %v453_v13 = vsel %vm266_vm0, %v3098_v61, 0.0 }
  0x93   : > { %451 = vadd.xlane.f32.xlu1 %v450_v48  ;;  %448 = vadd.xlane.f32.xlu0 %v447_v49 }
  0x97   : > { %457 = vadd.xlane.f32.xlu1 %v456_v12  ;;  %454 = vadd.xlane.f32.xlu0 %v453_v13 }
  0xa4   : > { %v275_v30 = vpop.xlane.xlu1 %274  ;;  %v269_v11 = vpop.xlane.xlu0 %268 }
  0xa5   : > { %v910_v25 = vmax.f32 %v275_v30, 1e-24  ;;  %v908_v24 = vmax.f32 %v269_v11, 1e-24 }
  0xa7   : > { %2070 = vrsqrt.f32 %v910_v25 }
  0xa8   : > { %2072 = vrsqrt.f32 %v908_v24  ;;  %v278_v43 = vpop.xlane.xlu1 %277  ;;  %525 = vrot.lane.b32.xlu1 %v2554_v7, %s2478_s21  ;;  %v272_v48 = vpop.xlane.xlu0 %271 }
  0xa9   : > { %v911_v49 = vmax.f32 %v278_v43, 1e-24  ;;  %v909_v42 = vmax.f32 %v272_v48, 1e-24 }
  0xab   : > { %2074 = vrsqrt.f32 %v911_v49 }
  0xac   : > { %2076 = vrsqrt.f32 %v909_v42  ;;  %v284_v60 = vpop.xlane.xlu1 %283  ;;  %527 = vrot.lane.b32.xlu1 %v2539_v3, %s2478_s21  ;;  %v281_v12 = vpop.xlane.xlu0 %280 }
  0xad   : > { %v913_v30 = vmax.f32 %v284_v60, 1e-24  ;;  %v912_v11 = vmax.f32 %v281_v12, 1e-24  ;;  %523 = vrot.lane.b32.xlu0 %v2543_v4, %s2478_s21 }
  0xaf   : > { %2078 = vrsqrt.f32 %v913_v30 }
  0xb0   : > { %2080 = vrsqrt.f32 %v912_v11  ;;  %v290_v24 = vpop.xlane.xlu1 %289  ;;  %529 = vrot.lane.b32.xlu1 %v2547_v5, %s2478_s21  ;;  %v287_v7 = vpop.xlane.xlu0 %286 }
  0xb1   : > { %v915_v25 = vmax.f32 %v290_v24, 1e-24  ;;  %v914_v42 = vmax.f32 %v287_v7, 1e-24  ;;  %531 = vrot.lane.b32.xlu0 %v2576_v15, %s2478_s21 }
  0xb3   : > { %2082 = vrsqrt.f32 %v915_v25 }
  0xb4   : > { %v2071_v3 = vpop.eup %2070  ;;  %2084 = vrsqrt.f32 %v914_v42  ;;  %v296_v43 = vpop.xlane.xlu1 %295  ;;  %533 = vrot.lane.b32.xlu1 %v2572_v14, %s2478_s21 }
  0xb5   : > { %v293_v4 = vpop.xlane.xlu0 %292  ;;  %v2073_v60 = vpop.eup %2072  ;;  %v1166_v13 = vmul.f32 %v2071_v3, %v2529_v0  ;;  %v917_v48 = vmax.f32 %v296_v43, 1e-24  ;;  %535 = vrot.lane.b32.xlu0 %v2594_v21, %s2478_s21 }
  0xb6   : > { %v916_v5 = vmax.f32 %v293_v4, 1e-24  ;;  %v1164_v49 = vmul.f32 %v2073_v60, %v2532_v1 }
  0xb7   : > { %1230 = vst.msk [vmem:[%s3121_s24 + $0x10] sm:$0xff] %vm266_vm0, %v1166_v13  ;;  %2086 = vrsqrt.f32 %v917_v48 }
  0xb8   : > { %v2075_v14 = vpop.eup %2074  ;;  %1228 = vst.msk [vmem:[%s3121_s24] sm:$0xff] %vm266_vm0, %v1164_v49  ;;  %2088 = vrsqrt.f32 %v916_v5  ;;  %v302_v0 = vpop.xlane.xlu1 %301  ;;  %537 = vrot.lane.b32.xlu1 %v2590_v20, %s2478_s21 }
  0xb9   : > { %v299_v15 = vpop.xlane.xlu0 %298  ;;  %v2077_v21 = vpop.eup %2076  ;;  %v1167_v1 = vmul.f32 %v2075_v14, %v2535_v2  ;;  %v919_v12 = vmax.f32 %v302_v0, 1e-24  ;;  %539 = vrot.lane.b32.xlu0 %v2612_v27, %s2478_s21 }
  0xba   : > { %v918_v30 = vmax.f32 %v299_v15, 1e-24  ;;  %v1165_v11 = vmul.f32 %v2077_v21, %v2550_v6 }
  0xbb   : > { %1231 = vst.msk [vmem:[%s3121_s24 + $0x18] sm:$0xff] %vm266_vm0, %v1167_v1  ;;  %2090 = vrsqrt.f32 %v919_v12 }
  0xbc   : > { %v2079_v24 = vpop.eup %2078  ;;  %1229 = vst.msk [vmem:[%s3121_s24 + $0x8] sm:$0xff] %vm266_vm0, %v1165_v11  ;;  %2092 = vrsqrt.f32 %v918_v30  ;;  %v308_v20 = vpop.xlane.xlu1 %307  ;;  %541 = vrot.lane.b32.xlu1 %v2608_v26, %s2478_s21 }
  0xbd   : > { %v305_v2 = vpop.xlane.xlu0 %304  ;;  %v2081_v7 = vpop.eup %2080  ;;  %v1169_v25 = vmul.f32 %v2079_v24, %v2557_v8  ;;  %v921_v27 = vmax.f32 %v308_v20, 1e-24  ;;  %543 = vrot.lane.b32.xlu0 %v2630_v33, %s2478_s21 }
  0xbe   : > { %v920_v42 = vmax.f32 %v305_v2, 1e-24  ;;  %v1168_v6 = vmul.f32 %v2081_v7, %v2560_v9 }
  0xbf   : > { %1233 = vst.msk [vmem:[%s3121_s24 + $0x28] sm:$0xff] %vm266_vm0, %v1169_v25  ;;  %2094 = vrsqrt.f32 %v921_v27 }
  0xc0   : > { %v2083_v3 = vpop.eup %2082  ;;  %1232 = vst.msk [vmem:[%s3121_s24 + $0x20] sm:$0xff] %vm266_vm0, %v1168_v6  ;;  %2096 = vrsqrt.f32 %v920_v42  ;;  %v314_v26 = vpop.xlane.xlu1 %313  ;;  %545 = vrot.lane.b32.xlu1 %v2626_v32, %s2478_s21 }
  0xc1   : > { %v311_v8 = vpop.xlane.xlu0 %310  ;;  %v2085_v43 = vpop.eup %2084  ;;  %v1171_v4 = vmul.f32 %v2083_v3, %v2579_v16  ;;  %v923_v33 = vmax.f32 %v314_v26, 1e-24  ;;  %547 = vrot.lane.b32.xlu0 %v2648_v39, %s2478_s21 }
  0xc2   : > { %v922_v60 = vmax.f32 %v311_v8, 1e-24  ;;  %v1170_v9 = vmul.f32 %v2085_v43, %v2582_v17 }
  0xc3   : > { %1235 = vst.msk [vmem:[%s3121_s24 + $0x38] sm:$0xff] %vm266_vm0, %v1171_v4  ;;  %2098 = vrsqrt.f32 %v923_v33 }
  0xc4   : > { %v2087_v13 = vpop.eup %2086  ;;  %1234 = vst.msk [vmem:[%s3121_s24 + $0x30] sm:$0xff] %vm266_vm0, %v1170_v9  ;;  %2100 = vrsqrt.f32 %v922_v60  ;;  %v320_v32 = vpop.xlane.xlu1 %319  ;;  %549 = vrot.lane.b32.xlu1 %v2644_v38, %s2478_s21 }
  0xc5   : > { %v317_v16 = vpop.xlane.xlu0 %316  ;;  %v2089_v48 = vpop.eup %2088  ;;  %v1173_v5 = vmul.f32 %v2087_v13, %v2597_v22  ;;  %v925_v39 = vmax.f32 %v320_v32, 1e-24  ;;  %551 = vrot.lane.b32.xlu0 %v2666_v45, %s2478_s21 }
  0xc6   : > { %v924_v49 = vmax.f32 %v317_v16, 1e-24  ;;  %v1172_v17 = vmul.f32 %v2089_v48, %v2600_v23 }
  0xc7   : > { %1237 = vst.msk [vmem:[%s3121_s24 + $0x48] sm:$0xff] %vm266_vm0, %v1173_v5  ;;  %2102 = vrsqrt.f32 %v925_v39 }
  0xc8   : > { %v2091_v14 = vpop.eup %2090  ;;  %1236 = vst.msk [vmem:[%s3121_s24 + $0x40] sm:$0xff] %vm266_vm0, %v1172_v17  ;;  %2104 = vrsqrt.f32 %v924_v49  ;;  %v326_v38 = vpop.xlane.xlu1 %325  ;;  %553 = vrot.lane.b32.xlu1 %v2662_v44, %s2478_s21  ;;  %v4171_v49 = vld [vmem:[#allocation10_spill] sm:$0xff] }
  0xc9   : > { %v323_v22 = vpop.xlane.xlu0 %322  ;;  %v2093_v0 = vpop.eup %2092  ;;  %v1175_v15 = vmul.f32 %v2091_v14, %v2615_v28  ;;  %v927_v45 = vmax.f32 %v326_v38, 1e-24  ;;  %555 = vrot.lane.b32.xlu0 %v2684_v51, %s2478_s21  ;;  %v4172_v14 = vld [vmem:[#allocation4_spill] sm:$0xff] }
  0xca   : > { %v926_v21 = vmax.f32 %v323_v22, 1e-24  ;;  %v1174_v23 = vmul.f32 %v2093_v0, %v2618_v29  ;;  %v4173_v0 = vld [vmem:[#allocation14_spill] sm:$0xff] }
  0xcb   : > { %1239 = vst.msk [vmem:[%s3121_s24 + $0x58] sm:$0xff] %vm266_vm0, %v1175_v15  ;;  %2106 = vrsqrt.f32 %v927_v45  ;;  %v4174_v15 = vld [vmem:[#allocation5_spill] sm:$0xff] }
  0xcc   : > { %v2095_v1 = vpop.eup %2094  ;;  %1238 = vst.msk [vmem:[%s3121_s24 + $0x50] sm:$0xff] %vm266_vm0, %v1174_v23  ;;  %2108 = vrsqrt.f32 %v926_v21  ;;  %v332_v44 = vpop.xlane.xlu1 %331  ;;  %557 = vrot.lane.b32.xlu1 %v2680_v50, %s2478_s21 }
  0xcd   : > { %v329_v28 = vpop.xlane.xlu0 %328  ;;  %v2097_v12 = vpop.eup %2096  ;;  %v1177_v30 = vmul.f32 %v2095_v1, %v2633_v34  ;;  %v929_v51 = vmax.f32 %v332_v44, 1e-24  ;;  %559 = vrot.lane.b32.xlu0 %v2702_v57, %s2478_s21  ;;  %v4175_v1 = vld [vmem:[#allocation13_spill] sm:$0xff] }
  0xce   : > { %v928_v11 = vmax.f32 %v329_v28, 1e-24  ;;  %v1176_v29 = vmul.f32 %v2097_v12, %v2636_v35  ;;  %v4176_v12 = vld [vmem:[#allocation6_spill] sm:$0xff] }
  0xcf   : > { %1241 = vst.msk [vmem:[%s3121_s24 + $0x68] sm:$0xff] %vm266_vm0, %v1177_v30  ;;  %2110 = vrsqrt.f32 %v929_v51 }
  0xd0   : > { %v2099_v24 = vpop.eup %2098  ;;  %1240 = vst.msk [vmem:[%s3121_s24 + $0x60] sm:$0xff] %vm266_vm0, %v1176_v29  ;;  %2112 = vrsqrt.f32 %v928_v11  ;;  %v338_v50 = vpop.xlane.xlu1 %337  ;;  %561 = vrot.lane.b32.xlu1 %v2698_v56, %s2478_s21  ;;  %v4177_v29 = vld [vmem:[#allocation18_spill] sm:$0xff] }
  0xd1   : > { %v335_v34 = vpop.xlane.xlu0 %334  ;;  %v2101_v20 = vpop.eup %2100  ;;  %v1179_v2 = vmul.f32 %v2099_v24, %v2651_v40  ;;  %v931_v57 = vmax.f32 %v338_v50, 1e-24  ;;  %563 = vrot.lane.b32.xlu0 %v2720_v63, %s2478_s21  ;;  %v4178_v24 = vld [vmem:[#allocation7_spill] sm:$0xff] }
  0xd2   : > { %v930_v7 = vmax.f32 %v335_v34, 1e-24  ;;  %v1178_v35 = vmul.f32 %v2101_v20, %v2654_v41 }
  0xd3   : > { %1243 = vst.msk [vmem:[%s3121_s24 + $0x78] sm:$0xff] %vm266_vm0, %v1179_v2  ;;  %2114 = vrsqrt.f32 %v931_v57  ;;  %v4179_v2 = vld [vmem:[#allocation17_spill] sm:$0xff] }
  0xd4   : > { %v2103_v25 = vpop.eup %2102  ;;  %1242 = vst.msk [vmem:[%s3121_s24 + $0x70] sm:$0xff] %vm266_vm0, %v1178_v35  ;;  %2116 = vrsqrt.f32 %v930_v7  ;;  %v344_v56 = vpop.xlane.xlu1 %343  ;;  %565 = vrot.lane.b32.xlu1 %v2716_v62, %s2478_s21  ;;  %v4180_v35 = vld [vmem:[#allocation8_spill] sm:$0xff] }
  0xd5   : > { %v341_v40 = vpop.xlane.xlu0 %340  ;;  %v2105_v27 = vpop.eup %2104  ;;  %v1181_v42 = vmul.f32 %v2103_v25, %v2669_v46  ;;  %v933_v63 = vmax.f32 %v344_v56, 1e-24  ;;  %567 = vrot.lane.b32.xlu0 %v2738_v19, %s2478_s21 }
  0xd6   : > { %v932_v6 = vmax.f32 %v341_v40, 1e-24  ;;  %v1180_v41 = vmul.f32 %v2105_v27, %v2672_v47  ;;  %v4181_v27 = vld [vmem:[#allocation22_spill] sm:$0xff] }
  0xd7   : > { %1245 = vst.msk [vmem:[%s3121_s24 + $0x88] sm:$0xff] %vm266_vm0, %v1181_v42  ;;  %2118 = vrsqrt.f32 %v933_v63  ;;  %v4182_v42 = vld [vmem:[#allocation9_spill] sm:$0xff] }
  0xd8   : > { %v2107_v3 = vpop.eup %2106  ;;  %1244 = vst.msk [vmem:[%s3121_s24 + $0x80] sm:$0xff] %vm266_vm0, %v1180_v41  ;;  %2120 = vrsqrt.f32 %v932_v6  ;;  %v350_v62 = vpop.xlane.xlu1 %349  ;;  %569 = vrot.lane.b32.xlu1 %v2734_v18, %s2478_s21 }
  0xd9   : > { %v347_v46 = vpop.xlane.xlu0 %346  ;;  %v2109_v26 = vpop.eup %2108  ;;  %v1183_v8 = vmul.f32 %v2107_v3, %v2687_v52  ;;  %v935_v19 = vmax.f32 %v350_v62, 1e-24  ;;  %571 = vrot.lane.b32.xlu0 %v2756_v37, %s2478_s21  ;;  %v4183_v3 = vld [vmem:[#allocation21_spill] sm:$0xff] }
  0xda   : > { %v934_v43 = vmax.f32 %v347_v46, 1e-24  ;;  %v1182_v47 = vmul.f32 %v2109_v26, %v2690_v53  ;;  %v4184_v26 = vld [vmem:[#allocation11_spill] sm:$0xff] }
  0xdb   : > { %1247 = vst.msk [vmem:[%s3121_s24 + $0x98] sm:$0xff] %vm266_vm0, %v1183_v8  ;;  %2122 = vrsqrt.f32 %v935_v19 }
  0xdc   : > { %v2111_v4 = vpop.eup %2110  ;;  %1246 = vst.msk [vmem:[%s3121_s24 + $0x90] sm:$0xff] %vm266_vm0, %v1182_v47  ;;  %2124 = vrsqrt.f32 %v934_v43  ;;  %v356_v18 = vpop.xlane.xlu1 %355  ;;  %573 = vrot.lane.b32.xlu1 %v2752_v36, %s2478_s21  ;;  %v4185_v47 = vld [vmem:[#allocation26_spill] sm:$0xff] }
  0xdd   : > { %v353_v52 = vpop.xlane.xlu0 %352  ;;  %v2113_v33 = vpop.eup %2112  ;;  %v1185_v60 = vmul.f32 %v2111_v4, %v2705_v58  ;;  %v937_v37 = vmax.f32 %v356_v18, 1e-24  ;;  %575 = vrot.lane.b32.xlu0 %v2774_v55, %s2478_s21  ;;  %v4186_v4 = vld [vmem:[#allocation12_spill] sm:$0xff] }
  0xde   : > { %v936_v9 = vmax.f32 %v353_v52, 1e-24  ;;  %v1184_v53 = vmul.f32 %v2113_v33, %v2708_v59  ;;  %v4170_v59 = vld [vmem:[#allocation3_spill] sm:$0xff] }
  0xdf   : > { %1249 = vst.msk [vmem:[%s3121_s24 + $0xa8] sm:$0xff] %vm266_vm0, %v1185_v60  ;;  %2126 = vrsqrt.f32 %v937_v37  ;;  %v4187_v60 = vld [vmem:[#allocation25_spill] sm:$0xff] }
  0xe0   : > { %v2115_v13 = vpop.eup %2114  ;;  %1248 = vst.msk [vmem:[%s3121_s24 + $0xa0] sm:$0xff] %vm266_vm0, %v1184_v53  ;;  %2128 = vrsqrt.f32 %v936_v9  ;;  %v362_v36 = vpop.xlane.xlu1 %361  ;;  %577 = vrot.lane.b32.xlu1 %v2770_v54, %s2478_s21  ;;  %v4188_v53 = vld [vmem:[#allocation15_spill] sm:$0xff] }
  0xe1   : > { %v359_v58 = vpop.xlane.xlu0 %358  ;;  %v2117_v32 = vpop.eup %2116  ;;  %v1187_v16 = vmul.f32 %v2115_v13, %v2723_v10  ;;  %v939_v55 = vmax.f32 %v362_v36, 1e-24  ;;  %579 = vrot.lane.b32.xlu0 %v2792_v31, %s2478_s21 }
  0xe2   : > { %v938_v48 = vmax.f32 %v359_v58, 1e-24  ;;  %v1186_v5 = vmul.f32 %v2117_v32, %v4170_v59  ;;  %v4189_v32 = vld [vmem:[#allocation30_spill] sm:$0xff] }
  0xe3   : > { %1251 = vst.msk [vmem:[%s3121_s24 + $0xb8] sm:$0xff] %vm266_vm0, %v1187_v16  ;;  %2130 = vrsqrt.f32 %v939_v55  ;;  %v4190_v16 = vld [vmem:[#allocation16_spill] sm:$0xff] }
  0xe4   : > { %v2119_v39 = vpop.eup %2118  ;;  %1250 = vst.msk [vmem:[%s3121_s24 + $0xb0] sm:$0xff] %vm266_vm0, %v1186_v5  ;;  %2132 = vrsqrt.f32 %v938_v48  ;;  %v368_v54 = vpop.xlane.xlu1 %367  ;;  %581 = vrot.lane.b32.xlu1 %v4171_v49, %s2478_s21  ;;  %v4191_v5 = vld [vmem:[#allocation29_spill] sm:$0xff]  ;;  %v4192_v49 = vld [vmem:[#allocation19_spill] sm:$0xff] }
  0xe5   : > { %v365_v10 = vpop.xlane.xlu0 %364  ;;  %v2121_v17 = vpop.eup %2120  ;;  %v1189_v38 = vmul.f32 %v2119_v39, %v4172_v14  ;;  %v941_v31 = vmax.f32 %v368_v54, 1e-24  ;;  %583 = vrot.lane.b32.xlu0 %v4173_v0, %s2478_s21 }
  0xe6   : > { %v940_v22 = vmax.f32 %v365_v10, 1e-24  ;;  %v1188_v45 = vmul.f32 %v2121_v17, %v4174_v15 }
  0xe7   : > { %1253 = vst.msk [vmem:[%s3121_s24 + $0xc8] sm:$0xff] %vm266_vm0, %v1189_v38  ;;  %2134 = vrsqrt.f32 %v941_v31  ;;  %v4193_v38 = vld [vmem:[#allocation34_spill] sm:$0xff]  ;;  %v4194_v31 = vld [vmem:[#allocation20_spill] sm:$0xff] }
  0xe8   : > { %v2123_v21 = vpop.eup %2122  ;;  %1252 = vst.msk [vmem:[%s3121_s24 + $0xc0] sm:$0xff] %vm266_vm0, %v1188_v45  ;;  %2136 = vrsqrt.f32 %v940_v22  ;;  %v374_v23 = vpop.xlane.xlu1 %373  ;;  %585 = vrot.lane.b32.xlu1 %v4175_v1, %s2478_s21  ;;  %v4195_v45 = vld [vmem:[#allocation33_spill] sm:$0xff]  ;;  %v4196_v1 = vld [vmem:[#allocation23_spill] sm:$0xff] }
  0xe9   : > { %v371_v44 = vpop.xlane.xlu0 %370  ;;  %v2125_v28 = vpop.eup %2124  ;;  %v1191_v30 = vmul.f32 %v2123_v21, %v4176_v12  ;;  %v943_v51 = vmax.f32 %v374_v23, 1e-24  ;;  %587 = vrot.lane.b32.xlu0 %v4177_v29, %s2478_s21 }
  0xea   : > { %v942_v11 = vmax.f32 %v371_v44, 1e-24  ;;  %v1190_v50 = vmul.f32 %v2125_v28, %v4178_v24 }
  0xeb   : > { %1255 = vst.msk [vmem:[%s3121_s24 + $0xd8] sm:$0xff] %vm266_vm0, %v1191_v30  ;;  %2138 = vrsqrt.f32 %v943_v51  ;;  %v4197_v30 = vld [vmem:[#allocation38_spill] sm:$0xff]  ;;  %v4198_v51 = vld [vmem:[#allocation24_spill] sm:$0xff] }
  0xec   : > { %v2127_v34 = vpop.eup %2126  ;;  %1254 = vst.msk [vmem:[%s3121_s24 + $0xd0] sm:$0xff] %vm266_vm0, %v1190_v50  ;;  %2140 = vrsqrt.f32 %v942_v11  ;;  %v380_v20 = vpop.xlane.xlu1 %379  ;;  %589 = vrot.lane.b32.xlu1 %v4179_v2, %s2478_s21  ;;  %v4199_v50 = vld [vmem:[#allocation37_spill] sm:$0xff]  ;;  %v4200_v2 = vld [vmem:[#allocation27_spill] sm:$0xff] }
  0xed   : > { %v377_v57 = vpop.xlane.xlu0 %376  ;;  %v2129_v7 = vpop.eup %2128  ;;  %v1193_v25 = vmul.f32 %v2127_v34, %v4180_v35  ;;  %v945_v56 = vmax.f32 %v380_v20, 1e-24  ;;  %591 = vrot.lane.b32.xlu0 %v4181_v27, %s2478_s21 }
  0xee   : > { %v944_v40 = vmax.f32 %v377_v57, 1e-24  ;;  %v1192_v63 = vmul.f32 %v2129_v7, %v4182_v42 }
  0xef   : > { %1257 = vst.msk [vmem:[%s3121_s24 + $0xe8] sm:$0xff] %vm266_vm0, %v1193_v25  ;;  %2142 = vrsqrt.f32 %v945_v56  ;;  %v4201_v25 = vld [vmem:[#allocation42_spill] sm:$0xff]  ;;  %v4202_v56 = vld [vmem:[#allocation28_spill] sm:$0xff] }
  0xf0   : > { %v2131_v6 = vpop.eup %2130  ;;  %1256 = vst.msk [vmem:[%s3121_s24 + $0xe0] sm:$0xff] %vm266_vm0, %v1192_v63  ;;  %2144 = vrsqrt.f32 %v944_v40  ;;  %v386_v41 = vpop.xlane.xlu1 %385  ;;  %593 = vrot.lane.b32.xlu1 %v4183_v3, %s2478_s21  ;;  %v4203_v63 = vld [vmem:[#allocation41_spill] sm:$0xff]  ;;  %v4204_v3 = vld [vmem:[#allocation31_spill] sm:$0xff] }
  0xf1   : > { %v383_v62 = vpop.xlane.xlu0 %382  ;;  %v2133_v46 = vpop.eup %2132  ;;  %v1195_v8 = vmul.f32 %v2131_v6, %v4184_v26  ;;  %v947_v19 = vmax.f32 %v386_v41, 1e-24  ;;  %595 = vrot.lane.b32.xlu0 %v4185_v47, %s2478_s21 }
  0xf2   : > { %v946_v43 = vmax.f32 %v383_v62, 1e-24  ;;  %v1194_v18 = vmul.f32 %v2133_v46, %v4186_v4 }
  0xf3   : > { %1259 = vst.msk [vmem:[%s3121_s24 + $0xf8] sm:$0xff] %vm266_vm0, %v1195_v8  ;;  %2146 = vrsqrt.f32 %v947_v19  ;;  %v4205_v8 = vld [vmem:[#allocation46_spill] sm:$0xff]  ;;  %v4206_v19 = vld [vmem:[#allocation32_spill] sm:$0xff] }
  0xf4   : > { %v2135_v52 = vpop.eup %2134  ;;  %1258 = vst.msk [vmem:[%s3121_s24 + $0xf0] sm:$0xff] %vm266_vm0, %v1194_v18  ;;  %2148 = vrsqrt.f32 %v946_v43  ;;  %v392_v33 = vpop.xlane.xlu1 %391  ;;  %597 = vrot.lane.b32.xlu1 %v4187_v60, %s2478_s21  ;;  %v4207_v18 = vld [vmem:[#allocation45_spill] sm:$0xff]  ;;  %v4208_v60 = vld [vmem:[#allocation35_spill] sm:$0xff] }
  0xf5   : > { %v389_v37 = vpop.xlane.xlu0 %388  ;;  %v2137_v9 = vpop.eup %2136  ;;  %v1197_v13 = vmul.f32 %v2135_v52, %v4188_v53  ;;  %v949_v36 = vmax.f32 %v392_v33, 1e-24  ;;  %599 = vrot.lane.b32.xlu0 %v4189_v32, %s2478_s21 }
  0xf6   : > { %v948_v58 = vmax.f32 %v389_v37, 1e-24  ;;  %v1196_v55 = vmul.f32 %v2137_v9, %v4190_v16 }
  0xf7   : > { %1261 = vst.msk [vmem:[%s3121_s24 + $0x108] sm:$0xff] %vm266_vm0, %v1197_v13  ;;  %2150 = vrsqrt.f32 %v949_v36  ;;  %v4209_v13 = vld [vmem:[#allocation50_spill] sm:$0xff]  ;;  %v4210_v36 = vld [vmem:[#allocation36_spill] sm:$0xff] }
  0xf8   : > { %v2139_v48 = vpop.eup %2138  ;;  %1260 = vst.msk [vmem:[%s3121_s24 + $0x100] sm:$0xff] %vm266_vm0, %v1196_v55  ;;  %2152 = vrsqrt.f32 %v948_v58  ;;  %v398_v59 = vpop.xlane.xlu1 %397  ;;  %601 = vrot.lane.b32.xlu1 %v4191_v5, %s2478_s21  ;;  %v4211_v55 = vld [vmem:[#allocation49_spill] sm:$0xff]  ;;  %v4212_v5 = vld [vmem:[#allocation39_spill] sm:$0xff] }
  0xf9   : > { %v395_v39 = vpop.xlane.xlu0 %394  ;;  %v2141_v54 = vpop.eup %2140  ;;  %v1199_v10 = vmul.f32 %v2139_v48, %v4192_v49  ;;  %v951_v17 = vmax.f32 %v398_v59, 1e-24  ;;  %603 = vrot.lane.b32.xlu0 %v4193_v38, %s2478_s21 }
  0xfa   : > { %v950_v14 = vmax.f32 %v395_v39, 1e-24  ;;  %v1198_v22 = vmul.f32 %v2141_v54, %v4194_v31 }
  0xfb   : > { %1263 = vst.msk [vmem:[%s3121_s24 + $0x118] sm:$0xff] %vm266_vm0, %v1199_v10  ;;  %2154 = vrsqrt.f32 %v951_v17  ;;  %v4213_v10 = vld [vmem:[#allocation54_spill] sm:$0xff]  ;;  %v4214_v17 = vld [vmem:[#allocation40_spill] sm:$0xff] }
  0xfc   : > { %v2143_v0 = vpop.eup %2142  ;;  %1262 = vst.msk [vmem:[%s3121_s24 + $0x110] sm:$0xff] %vm266_vm0, %v1198_v22  ;;  %2156 = vrsqrt.f32 %v950_v14  ;;  %v404_v15 = vpop.xlane.xlu1 %403  ;;  %605 = vrot.lane.b32.xlu1 %v4195_v45, %s2478_s21  ;;  %v4215_v22 = vld [vmem:[#allocation53_spill] sm:$0xff]  ;;  %v4216_v45 = vld [vmem:[#allocation43_spill] sm:$0xff] }
  0xfd   : > { %v401_v21 = vpop.xlane.xlu0 %400  ;;  %v2145_v23 = vpop.eup %2144  ;;  %v1201_v44 = vmul.f32 %v2143_v0, %v4196_v1  ;;  %v953_v28 = vmax.f32 %v404_v15, 1e-24  ;;  %607 = vrot.lane.b32.xlu0 %v4197_v30, %s2478_s21 }
  0xfe   : > { %v952_v12 = vmax.f32 %v401_v21, 1e-24  ;;  %v1200_v11 = vmul.f32 %v2145_v23, %v4198_v51 }
  0xff   : > { %1265 = vst.msk [vmem:[%s3121_s24 + $0x128] sm:$0xff] %vm266_vm0, %v1201_v44  ;;  %2158 = vrsqrt.f32 %v953_v28  ;;  %v4217_v44 = vld [vmem:[#allocation58_spill] sm:$0xff]  ;;  %v4218_v28 = vld [vmem:[#allocation44_spill] sm:$0xff] }
 0x100   : > { %v2147_v29 = vpop.eup %2146  ;;  %1264 = vst.msk [vmem:[%s3121_s24 + $0x120] sm:$0xff] %vm266_vm0, %v1200_v11  ;;  %2160 = vrsqrt.f32 %v952_v12  ;;  %v410_v24 = vpop.xlane.xlu1 %409  ;;  %609 = vrot.lane.b32.xlu1 %v4199_v50, %s2478_s21  ;;  %v4219_v11 = vld [vmem:[#allocation57_spill] sm:$0xff]  ;;  %v4220_v50 = vld [vmem:[#allocation47_spill] sm:$0xff] }
 0x101   : > { %v407_v34 = vpop.xlane.xlu0 %406  ;;  %v2149_v20 = vpop.eup %2148  ;;  %v1203_v57 = vmul.f32 %v2147_v29, %v4200_v2  ;;  %v955_v7 = vmax.f32 %v410_v24, 1e-24  ;;  %611 = vrot.lane.b32.xlu0 %v4201_v25, %s2478_s21 }
 0x102   : > { %v954_v35 = vmax.f32 %v407_v34, 1e-24  ;;  %v1202_v40 = vmul.f32 %v2149_v20, %v4202_v56 }
 0x103   : > { %1267 = vst.msk [vmem:[%s3121_s24 + $0x138] sm:$0xff] %vm266_vm0, %v1203_v57  ;;  %2162 = vrsqrt.f32 %v955_v7  ;;  %v4221_v57 = vld [vmem:[#allocation62_spill] sm:$0xff]  ;;  %v4222_v7 = vld [vmem:[#allocation48_spill] sm:$0xff] }
 0x104   : > { %v2151_v27 = vpop.eup %2150  ;;  %1266 = vst.msk [vmem:[%s3121_s24 + $0x130] sm:$0xff] %vm266_vm0, %v1202_v40  ;;  %2164 = vrsqrt.f32 %v954_v35  ;;  %v416_v42 = vpop.xlane.xlu1 %415  ;;  %613 = vrot.lane.b32.xlu1 %v4203_v63, %s2478_s21  ;;  %v4223_v40 = vld [vmem:[#allocation61_spill] sm:$0xff]  ;;  %v4224_v63 = vld [vmem:[#allocation51_spill] sm:$0xff] }
 0x105   : > { %v413_v6 = vpop.xlane.xlu0 %412  ;;  %v2153_v41 = vpop.eup %2152  ;;  %v1205_v62 = vmul.f32 %v2151_v27, %v4204_v3  ;;  %v957_v46 = vmax.f32 %v416_v42, 1e-24  ;;  %615 = vrot.lane.b32.xlu0 %v4205_v8, %s2478_s21 }
 0x106   : > { %v956_v26 = vmax.f32 %v413_v6, 1e-24  ;;  %v1204_v43 = vmul.f32 %v2153_v41, %v4206_v19 }
 0x107   : > { %1269 = vst.msk [vmem:[%s3121_s24 + $0x148] sm:$0xff] %vm266_vm0, %v1205_v62  ;;  %2166 = vrsqrt.f32 %v957_v46  ;;  %v4225_v62 = vld [vmem:[#allocation66_spill] sm:$0xff]  ;;  %v4226_v46 = vld [vmem:[#allocation52_spill] sm:$0xff] }
 0x108   : > { %v2155_v47 = vpop.eup %2154  ;;  %1268 = vst.msk [vmem:[%s3121_s24 + $0x140] sm:$0xff] %vm266_vm0, %v1204_v43  ;;  %2168 = vrsqrt.f32 %v956_v26  ;;  %v422_v4 = vpop.xlane.xlu1 %421  ;;  %617 = vrot.lane.b32.xlu1 %v4207_v18, %s2478_s21  ;;  %v4227_v43 = vld [vmem:[#allocation65_spill] sm:$0xff]  ;;  %v4228_v18 = vld [vmem:[#allocation55_spill] sm:$0xff] }
 0x109   : > { %v419_v52 = vpop.xlane.xlu0 %418  ;;  %v2157_v33 = vpop.eup %2156  ;;  %v1207_v37 = vmul.f32 %v2155_v47, %v4208_v60  ;;  %v959_v9 = vmax.f32 %v422_v4, 1e-24  ;;  %619 = vrot.lane.b32.xlu0 %v4209_v13, %s2478_s21 }
 0x10a   : > { %v958_v53 = vmax.f32 %v419_v52, 1e-24  ;;  %v1206_v58 = vmul.f32 %v2157_v33, %v4210_v36 }
 0x10b   : > { %1271 = vst.msk [vmem:[%s3121_s24 + $0x158] sm:$0xff] %vm266_vm0, %v1207_v37  ;;  %2170 = vrsqrt.f32 %v959_v9  ;;  %v4229_v37 = vld [vmem:[#allocation70_spill] sm:$0xff]  ;;  %v4230_v9 = vld [vmem:[#allocation56_spill] sm:$0xff] }
 0x10c   : > { %v2159_v32 = vpop.eup %2158  ;;  %1270 = vst.msk [vmem:[%s3121_s24 + $0x150] sm:$0xff] %vm266_vm0, %v1206_v58  ;;  %2172 = vrsqrt.f32 %v958_v53  ;;  %v428_v16 = vpop.xlane.xlu1 %427  ;;  %621 = vrot.lane.b32.xlu1 %v4211_v55, %s2478_s21  ;;  %v4231_v58 = vld [vmem:[#allocation69_spill] sm:$0xff]  ;;  %v4232_v55 = vld [vmem:[#allocation59_spill] sm:$0xff] }
 0x10d   : > { %v425_v48 = vpop.xlane.xlu0 %424  ;;  %v2161_v59 = vpop.eup %2160  ;;  %v1209_v39 = vmul.f32 %v2159_v32, %v4212_v5  ;;  %v961_v54 = vmax.f32 %v428_v16, 1e-24  ;;  %623 = vrot.lane.b32.xlu0 %v4213_v10, %s2478_s21 }
 0x10e   : > { %v960_v49 = vmax.f32 %v425_v48, 1e-24  ;;  %v1208_v14 = vmul.f32 %v2161_v59, %v4214_v17  ;;  %v4235_v17 = vld [vmem:[#allocation73_spill] sm:$0xff] }
 0x10f   : > { %1273 = vst.msk [vmem:[%s3121_s24 + $0x168] sm:$0xff] %vm266_vm0, %v1209_v39  ;;  %2174 = vrsqrt.f32 %v961_v54  ;;  %v4233_v39 = vld [vmem:[#allocation74_spill] sm:$0xff]  ;;  %v4234_v54 = vld [vmem:[#allocation60_spill] sm:$0xff] }
 0x110   : > { %v2163_v38 = vpop.eup %2162  ;;  %1272 = vst.msk [vmem:[%s3121_s24 + $0x160] sm:$0xff] %vm266_vm0, %v1208_v14  ;;  %2176 = vrsqrt.f32 %v960_v49  ;;  %v434_v31 = vpop.xlane.xlu1 %433  ;;  %625 = vrot.lane.b32.xlu1 %v4215_v22, %s2478_s21  ;;  %v4236_v22 = vld [vmem:[#allocation63_spill] sm:$0xff] }
 0x111   : > { %v431_v0 = vpop.xlane.xlu0 %430  ;;  %v2165_v15 = vpop.eup %2164  ;;  %v1211_v21 = vmul.f32 %v2163_v38, %v4216_v45  ;;  %v963_v23 = vmax.f32 %v434_v31, 1e-24  ;;  %627 = vrot.lane.b32.xlu0 %v4217_v44, %s2478_s21 }
 0x112   : > { %v962_v1 = vmax.f32 %v431_v0, 1e-24  ;;  %v1210_v12 = vmul.f32 %v2165_v15, %v4218_v28  ;;  %v4237_v15 = vld [vmem:[#allocation64_spill] sm:$0xff] }
 0x113   : > { %1275 = vst.msk [vmem:[%s3121_s24 + $0x178] sm:$0xff] %vm266_vm0, %v1211_v21  ;;  %2178 = vrsqrt.f32 %v963_v23  ;;  %v4238_v23 = vld [vmem:[#allocation77_spill] sm:$0xff] }
 0x114   : > { %v2167_v30 = vpop.eup %2166  ;;  %1274 = vst.msk [vmem:[%s3121_s24 + $0x170] sm:$0xff] %vm266_vm0, %v1210_v12  ;;  %2180 = vrsqrt.f32 %v962_v1  ;;  %v440_v51 = vpop.xlane.xlu1 %439  ;;  %629 = vrot.lane.b32.xlu1 %v4219_v11, %s2478_s21  ;;  %v4239_v12 = vld [vmem:[#allocation67_spill] sm:$0xff] }
 0x115   : > { %v437_v29 = vpop.xlane.xlu0 %436  ;;  %v2169_v24 = vpop.eup %2168  ;;  %v1213_v34 = vmul.f32 %v2167_v30, %v4220_v50  ;;  %v965_v20 = vmax.f32 %v440_v51, 1e-24  ;;  %631 = vrot.lane.b32.xlu0 %v4221_v57, %s2478_s21  ;;  %v4240_v51 = vld [vmem:[#allocation68_spill] sm:$0xff] }
 0x116   : > { %v964_v2 = vmax.f32 %v437_v29, 1e-24  ;;  %v1212_v35 = vmul.f32 %v2169_v24, %v4222_v7 }
 0x117   : > { %1277 = vst.msk [vmem:[%s3121_s24 + $0x188] sm:$0xff] %vm266_vm0, %v1213_v34  ;;  %2182 = vrsqrt.f32 %v965_v20  ;;  %v4241_v34 = vld [vmem:[#allocation71_spill] sm:$0xff] }
 0x118   : > { %v2171_v25 = vpop.eup %2170  ;;  %1276 = vst.msk [vmem:[%s3121_s24 + $0x180] sm:$0xff] %vm266_vm0, %v1212_v35  ;;  %2184 = vrsqrt.f32 %v964_v2  ;;  %v446_v56 = vpop.xlane.xlu1 %445  ;;  %633 = vrot.lane.b32.xlu1 %v4223_v40, %s2478_s21  ;;  %v4242_v2 = vld [vmem:[#allocation72_spill] sm:$0xff]  ;;  %v4243_v40 = vld [vmem:[#allocation75_spill] sm:$0xff] }
 0x119   : > { %v443_v27 = vpop.xlane.xlu0 %442  ;;  %v2173_v42 = vpop.eup %2172  ;;  %v1215_v6 = vmul.f32 %v2171_v25, %v4224_v63  ;;  %v967_v41 = vmax.f32 %v446_v56, 1e-24  ;;  %635 = vrot.lane.b32.xlu0 %v4225_v62, %s2478_s21 }
 0x11a   : > { %v966_v3 = vmax.f32 %v443_v27, 1e-24  ;;  %v1214_v26 = vmul.f32 %v2173_v42, %v4226_v46  ;;  %v4244_v42 = vld [vmem:[#allocation76_spill] sm:$0xff] }
 0x11b   : > { %1279 = vst.msk [vmem:[%s3121_s24 + $0x198] sm:$0xff] %vm266_vm0, %v1215_v6  ;;  %2186 = vrsqrt.f32 %v967_v41 }
 0x11c   : > { %v2175_v8 = vpop.eup %2174  ;;  %1278 = vst.msk [vmem:[%s3121_s24 + $0x190] sm:$0xff] %vm266_vm0, %v1214_v26  ;;  %2188 = vrsqrt.f32 %v966_v3  ;;  %v452_v19 = vpop.xlane.xlu1 %451  ;;  %637 = vrot.lane.b32.xlu1 %v4227_v43, %s2478_s21 }
 0x11d   : > { %v449_v47 = vpop.xlane.xlu0 %448  ;;  %v2177_v4 = vpop.eup %2176  ;;  %v1217_v52 = vmul.f32 %v2175_v8, %v4228_v18  ;;  %v969_v33 = vmax.f32 %v452_v19, 1e-24  ;;  %639 = vrot.lane.b32.xlu0 %v4229_v37, %s2478_s21 }
 0x11e   : > { %v968_v60 = vmax.f32 %v449_v47, 1e-24  ;;  %v1216_v53 = vmul.f32 %v2177_v4, %v4230_v9 }
 0x11f   : > { %1281 = vst.msk [vmem:[%s3121_s24 + $0x1a8] sm:$0xff] %vm266_vm0, %v1217_v52  ;;  %2190 = vrsqrt.f32 %v969_v33 }
 0x120   : > { %v2179_v13 = vpop.eup %2178  ;;  %1280 = vst.msk [vmem:[%s3121_s24 + $0x1a0] sm:$0xff] %vm266_vm0, %v1216_v53  ;;  %2192 = vrsqrt.f32 %v968_v60  ;;  %v458_v36 = vpop.xlane.xlu1 %457  ;;  %641 = vrot.lane.b32.xlu1 %v4231_v58, %s2478_s21 }
 0x121   : > { %v455_v32 = vpop.xlane.xlu0 %454  ;;  %v2181_v16 = vpop.eup %2180  ;;  %v1219_v48 = vmul.f32 %v2179_v13, %v4232_v55  ;;  %v971_v59 = vmax.f32 %v458_v36, 1e-24  ;;  %643 = vrot.lane.b32.xlu0 %v4233_v39, %s2478_s21 }
 0x122   : > { %v970_v5 = vmax.f32 %v455_v32, 1e-24  ;;  %v1218_v49 = vmul.f32 %v2181_v16, %v4234_v54 }
 0x123   : > { %1283 = vst.msk [vmem:[%s3121_s24 + $0x1b8] sm:$0xff] %vm266_vm0, %v1219_v48  ;;  %2194 = vrsqrt.f32 %v971_v59 }
 0x124   : > { %v2183_v10 = vpop.eup %2182  ;;  %1282 = vst.msk [vmem:[%s3121_s24 + $0x1b0] sm:$0xff] %vm266_vm0, %v1218_v49  ;;  %2196 = vrsqrt.f32 %v970_v5  ;;  %645 = vrot.lane.b32.xlu1 %v4235_v17, %s2478_s21  ;;  %v526_v14 = vpop.permute.xlu1 %525 }
 0x125   : > { %v524_v38 = vpop.permute.xlu0 %523  ;;  %v2185_v31 = vpop.eup %2184  ;;  %v1221_v0 = vmul.f32 %v2183_v10, %v4236_v22  ;;  %647 = vrot.lane.b32.xlu0 %v3098_v61, %s2478_s21  ;;  %v719_v60 = vsel %vm715_vm1, %v526_v14, 0.0 }
 0x126   : > { %v1220_v45 = vmul.f32 %v2185_v31, %v4237_v15  ;;  %v716_v43 = vsel %vm715_vm1, %v524_v38, 0.0 }
 0x127   : > { %1285 = vst.msk [vmem:[%s3121_s24 + $0x1c8] sm:$0xff] %vm266_vm0, %v1221_v0 }
 0x128   : > { %v2187_v21 = vpop.eup %2186  ;;  %1284 = vst.msk [vmem:[%s3121_s24 + $0x1c0] sm:$0xff] %vm266_vm0, %v1220_v45  ;;  %649 = vrot.lane.b32.xlu1 %v4238_v23, %s2478_s21  ;;  %v528_v1 = vpop.permute.xlu1 %527 }
 0x129   : > { %v532_v44 = vpop.permute.xlu0 %531  ;;  %v2189_v28 = vpop.eup %2188  ;;  %v1223_v30 = vmul.f32 %v2187_v21, %v4239_v12  ;;  %v722_v18 = vsel %vm715_vm1, %v528_v1, 0.0 }
 0x12a   : > { %v1222_v11 = vmul.f32 %v2189_v28, %v4240_v51  ;;  %v728_v36 = vsel %vm715_vm1, %v532_v44, 0.0 }
 0x12b   : > { %1287 = vst.msk [vmem:[%s3121_s24 + $0x1d8] sm:$0xff] %vm266_vm0, %v1223_v30 }
 0x12c   : > { %v2191_v61 = vpop.eup %2190  ;;  %1286 = vst.msk [vmem:[%s3121_s24 + $0x1d0] sm:$0xff] %vm266_vm0, %v1222_v11  ;;  %v530_v29 = vpop.permute.xlu1 %529 }
 0x12d   : > { %v536_v24 = vpop.permute.xlu0 %535  ;;  %v2193_v50 = vpop.eup %2192  ;;  %v1225_v20 = vmul.f32 %v2191_v61, %v4241_v34  ;;  %v725_v37 = vsel %vm715_vm1, %v530_v29, 0.0 }
 0x12e   : > { %v1224_v57 = vmul.f32 %v2193_v50, %v4242_v2  ;;  %v734_v55 = vsel %vm715_vm1, %v536_v24, 0.0 }
 0x12f   : > { %1289 = vst.msk [vmem:[%s3121_s24 + $0x1e8] sm:$0xff] %vm266_vm0, %v1225_v20 }
 0x130   : > { %v2195_v7 = vpop.eup %2194  ;;  %1288 = vst.msk [vmem:[%s3121_s24 + $0x1e0] sm:$0xff] %vm266_vm0, %v1224_v57  ;;  %v534_v35 = vpop.permute.xlu1 %533 }
 0x131   : > { %v540_v25 = vpop.permute.xlu0 %539  ;;  %v2197_v56 = vpop.eup %2196  ;;  %v1227_v27 = vmul.f32 %v2195_v7, %v4243_v40  ;;  %v731_v13 = vsel %vm715_vm1, %v534_v35, 0.0 }
 0x132   : > { %v1226_v63 = vmul.f32 %v2197_v56, %v4244_v42  ;;  %v740_v39 = vsel %vm715_vm1, %v540_v25, 0.0 }
 0x133   : > { %1291 = vst.msk [vmem:[%s3121_s24 + $0x1f8] sm:$0xff] %vm266_vm0, %v1227_v27 }
 0x134   : > { %1290 = vst.msk [vmem:[%s3121_s24 + $0x1f0] sm:$0xff] %vm266_vm0, %v1226_v63  ;;  %v538_v6 = vpop.permute.xlu1 %537 }
 0x135   : > { %v544_v41 = vpop.permute.xlu0 %543  ;;  %v737_v16 = vsel %vm715_vm1, %v538_v6, 0.0 }
 0x136   : > { %v746_v17 = vsel %vm715_vm1, %v544_v41, 0.0 }
 0x138   : > { %v542_v3 = vpop.permute.xlu1 %541 }
 0x139   : > { %v548_v62 = vpop.permute.xlu0 %547  ;;  %v743_v5 = vsel %vm715_vm1, %v542_v3, 0.0 }
 0x13a   : > { %v752_v31 = vsel %vm715_vm1, %v548_v62, 0.0 }
 0x13c   : > { %v546_v46 = vpop.permute.xlu1 %545 }
 0x13d   : > { %v552_v26 = vpop.permute.xlu0 %551  ;;  %v749_v10 = vsel %vm715_vm1, %v546_v46, 0.0 }
 0x13e   : > { %v758_v45 = vsel %vm715_vm1, %v552_v26, 0.0 }
 0x140   : > { %v550_v8 = vpop.permute.xlu1 %549 }
 0x141   : > { %v556_v19 = vpop.permute.xlu0 %555  ;;  %v755_v38 = vsel %vm715_vm1, %v550_v8, 0.0 }
 0x142   : > { %v764_v44 = vsel %vm715_vm1, %v556_v19, 0.0 }
 0x144   : > { %v554_v47 = vpop.permute.xlu1 %553  ;;  %717 = vadd.xlane.f32.xlu0 %v716_v43 }
 0x145   : > { %v560_v4 = vpop.permute.xlu0 %559  ;;  %v761_v15 = vsel %vm715_vm1, %v554_v47, 0.0 }
 0x146   : > { %v770_v30 = vsel %vm715_vm1, %v560_v4, 0.0 }
 0x148   : > { %v558_v52 = vpop.permute.xlu1 %557  ;;  %723 = vadd.xlane.f32.xlu0 %v722_v18 }
 0x149   : > { %v564_v33 = vpop.permute.xlu0 %563  ;;  %v767_v1 = vsel %vm715_vm1, %v558_v52, 0.0 }
 0x14a   : > { %v776_v29 = vsel %vm715_vm1, %v564_v33, 0.0 }
 0x14c   : > { %720 = vadd.xlane.f32.xlu1 %v719_v60  ;;  %v562_v9 = vpop.permute.xlu1 %561  ;;  %726 = vadd.xlane.f32.xlu0 %v725_v37 }
 0x14d   : > { %v568_v53 = vpop.permute.xlu0 %567  ;;  %v773_v12 = vsel %vm715_vm1, %v562_v9, 0.0 }
 0x14e   : > { %v782_v20 = vsel %vm715_vm1, %v568_v53, 0.0 }
 0x150   : > { %732 = vadd.xlane.f32.xlu1 %v731_v13  ;;  %v566_v58 = vpop.permute.xlu1 %565  ;;  %729 = vadd.xlane.f32.xlu0 %v728_v36 }
 0x151   : > { %v572_v32 = vpop.permute.xlu0 %571  ;;  %v779_v61 = vsel %vm715_vm1, %v566_v58, 0.0 }
 0x152   : > { %v788_v57 = vsel %vm715_vm1, %v572_v32, 0.0 }
 0x154   : > { %738 = vadd.xlane.f32.xlu1 %v737_v16  ;;  %v570_v48 = vpop.permute.xlu1 %569  ;;  %735 = vadd.xlane.f32.xlu0 %v734_v55 }
 0x155   : > { %v576_v59 = vpop.permute.xlu0 %575  ;;  %v785_v34 = vsel %vm715_vm1, %v570_v48, 0.0 }
 0x156   : > { %v794_v56 = vsel %vm715_vm1, %v576_v59, 0.0 }
 0x158   : > { %744 = vadd.xlane.f32.xlu1 %v743_v5  ;;  %v574_v54 = vpop.permute.xlu1 %573  ;;  %741 = vadd.xlane.f32.xlu0 %v740_v39 }
 0x159   : > { %v580_v49 = vpop.permute.xlu0 %579  ;;  %v791_v2 = vsel %vm715_vm1, %v574_v54, 0.0 }
 0x15a   : > { %v800_v63 = vsel %vm715_vm1, %v580_v49, 0.0 }
 0x15c   : > { %750 = vadd.xlane.f32.xlu1 %v749_v10  ;;  %v578_v14 = vpop.permute.xlu1 %577  ;;  %747 = vadd.xlane.f32.xlu0 %v746_v17 }
 0x15d   : > { %v584_v22 = vpop.permute.xlu0 %583  ;;  %v797_v25 = vsel %vm715_vm1, %v578_v14, 0.0 }
 0x15e   : > { %v806_v41 = vsel %vm715_vm1, %v584_v22, 0.0 }
 0x160   : > { %756 = vadd.xlane.f32.xlu1 %v755_v38  ;;  %v582_v0 = vpop.permute.xlu1 %581  ;;  %753 = vadd.xlane.f32.xlu0 %v752_v31 }
 0x161   : > { %v588_v23 = vpop.permute.xlu0 %587  ;;  %v803_v42 = vsel %vm715_vm1, %v582_v0, 0.0 }
 0x162   : > { %v812_v46 = vsel %vm715_vm1, %v588_v23, 0.0 }
 0x164   : > { %762 = vadd.xlane.f32.xlu1 %v761_v15  ;;  %v586_v21 = vpop.permute.xlu1 %585  ;;  %759 = vadd.xlane.f32.xlu0 %v758_v45 }
 0x165   : > { %v592_v51 = vpop.permute.xlu0 %591  ;;  %v809_v6 = vsel %vm715_vm1, %v586_v21, 0.0 }
 0x166   : > { %v818_v43 = vsel %vm715_vm1, %v592_v51, 0.0 }
 0x168   : > { %768 = vadd.xlane.f32.xlu1 %v767_v1  ;;  %v590_v28 = vpop.permute.xlu1 %589  ;;  %765 = vadd.xlane.f32.xlu0 %v764_v44 }
 0x169   : > { %v596_v24 = vpop.permute.xlu0 %595  ;;  %v815_v26 = vsel %vm715_vm1, %v590_v28, 0.0 }
 0x16a   : > { %v824_v4 = vsel %vm715_vm1, %v596_v24, 0.0 }
 0x16c   : > { %774 = vadd.xlane.f32.xlu1 %v773_v12  ;;  %v594_v11 = vpop.permute.xlu1 %593  ;;  %771 = vadd.xlane.f32.xlu0 %v770_v30 }
 0x16d   : > { %v600_v7 = vpop.permute.xlu0 %599  ;;  %v821_v47 = vsel %vm715_vm1, %v594_v11, 0.0 }
 0x16e   : > { %v830_v60 = vsel %vm715_vm1, %v600_v7, 0.0 }
 0x170   : > { %780 = vadd.xlane.f32.xlu1 %v779_v61  ;;  %777 = vadd.xlane.f32.xlu0 %v776_v29  ;;  %v598_v50 = vpop.permute.xlu1 %597 }
 0x171   : > { %v604_v40 = vpop.permute.xlu0 %603  ;;  %v827_v18 = vsel %vm715_vm1, %v598_v50, 0.0 }
 0x172   : > { %v836_v13 = vsel %vm715_vm1, %v604_v40, 0.0 }
 0x174   : > { %786 = vadd.xlane.f32.xlu1 %v785_v34  ;;  %783 = vadd.xlane.f32.xlu0 %v782_v20  ;;  %v602_v35 = vpop.permute.xlu1 %601 }
 0x175   : > { %v608_v3 = vpop.permute.xlu0 %607  ;;  %v833_v37 = vsel %vm715_vm1, %v602_v35, 0.0 }
 0x176   : > { %v842_v58 = vsel %vm715_vm1, %v608_v3, 0.0 }
 0x178   : > { %792 = vadd.xlane.f32.xlu1 %v791_v2  ;;  %789 = vadd.xlane.f32.xlu0 %v788_v57  ;;  %v606_v27 = vpop.permute.xlu1 %605 }
 0x179   : > { %v612_v8 = vpop.permute.xlu0 %611  ;;  %v839_v36 = vsel %vm715_vm1, %v606_v27, 0.0 }
 0x17a   : > { %v848_v48 = vsel %vm715_vm1, %v612_v8, 0.0 }
 0x17c   : > { %798 = vadd.xlane.f32.xlu1 %v797_v25  ;;  %795 = vadd.xlane.f32.xlu0 %v794_v56  ;;  %v610_v62 = vpop.permute.xlu1 %609 }
 0x17d   : > { %v616_v52 = vpop.permute.xlu0 %615  ;;  %v845_v32 = vsel %vm715_vm1, %v610_v62, 0.0 }
 0x17e   : > { %v854_v54 = vsel %vm715_vm1, %v616_v52, 0.0 }
 0x180   : > { %804 = vadd.xlane.f32.xlu1 %v803_v42  ;;  %801 = vadd.xlane.f32.xlu0 %v800_v63  ;;  %v614_v19 = vpop.permute.xlu1 %613 }
 0x181   : > { %v620_v9 = vpop.permute.xlu0 %619  ;;  %v851_v59 = vsel %vm715_vm1, %v614_v19, 0.0  ;;  %v2326_v19 = vld [vmem:[%s2526_s20] sm:$0xff] }
 0x182   : > { %v860_v10 = vsel %vm715_vm1, %v620_v9, 0.0 }
 0x184   : > { %810 = vadd.xlane.f32.xlu1 %v809_v6  ;;  %807 = vadd.xlane.f32.xlu0 %v806_v41  ;;  %v618_v33 = vpop.permute.xlu1 %617 }
 0x185   : > { %v624_v16 = vpop.permute.xlu0 %623  ;;  %v857_v49 = vsel %vm715_vm1, %v618_v33, 0.0 }
 0x186   : > { %v866_v31 = vsel %vm715_vm1, %v624_v16, 0.0  ;;  %v2328_v16 = vld [vmem:[%s2526_s20 + $0x8] sm:$0xff] }
 0x188   : > { %816 = vadd.xlane.f32.xlu1 %v815_v26  ;;  %813 = vadd.xlane.f32.xlu0 %v812_v46  ;;  %v622_v53 = vpop.permute.xlu1 %621 }
 0x189   : > { %v628_v5 = vpop.permute.xlu0 %627  ;;  %v863_v17 = vsel %vm715_vm1, %v622_v53, 0.0 }
 0x18a   : > { %v872_v45 = vsel %vm715_vm1, %v628_v5, 0.0  ;;  %v2329_v5 = vld [vmem:[%s2526_s20 + $0x18] sm:$0xff] }
 0x18c   : > { %822 = vadd.xlane.f32.xlu1 %v821_v47  ;;  %819 = vadd.xlane.f32.xlu0 %v818_v43  ;;  %v626_v55 = vpop.permute.xlu1 %625 }
 0x18d   : > { %v632_v14 = vpop.permute.xlu0 %631  ;;  %v869_v22 = vsel %vm715_vm1, %v626_v55, 0.0 }
 0x18e   : > { %v878_v23 = vsel %vm715_vm1, %v632_v14, 0.0  ;;  %v2330_v14 = vld [vmem:[%s2526_s20 + $0x28] sm:$0xff] }
 0x190   : > { %828 = vadd.xlane.f32.xlu1 %v827_v18  ;;  %825 = vadd.xlane.f32.xlu0 %v824_v4  ;;  %v630_v39 = vpop.permute.xlu1 %629 }
 0x191   : > { %v636_v0 = vpop.permute.xlu0 %635  ;;  %v875_v21 = vsel %vm715_vm1, %v630_v39, 0.0 }
 0x192   : > { %v884_v12 = vsel %vm715_vm1, %v636_v0, 0.0  ;;  %v2331_v0 = vld [vmem:[%s2526_s20 + $0x20] sm:$0xff] }
 0x194   : > { %834 = vadd.xlane.f32.xlu1 %v833_v37  ;;  %831 = vadd.xlane.f32.xlu0 %v830_v60  ;;  %v634_v38 = vpop.permute.xlu1 %633  ;;  %v2327_v60 = vld [vmem:[%s2526_s20 + $0x10] sm:$0xff] }
 0x195   : > { %v881_v1 = vsel %vm715_vm1, %v634_v38, 0.0  ;;  %v640_v44 = vpop.permute.xlu0 %639 }
 0x196   : > { %v890_v61 = vsel %vm715_vm1, %v640_v44, 0.0  ;;  %v2332_v44 = vld [vmem:[%s2526_s20 + $0x38] sm:$0xff] }
 0x198   : > { %840 = vadd.xlane.f32.xlu1 %v839_v36  ;;  %837 = vadd.xlane.f32.xlu0 %v836_v13  ;;  %v638_v15 = vpop.permute.xlu1 %637 }
 0x199   : > { %v887_v30 = vsel %vm715_vm1, %v638_v15, 0.0  ;;  %v644_v51 = vpop.permute.xlu0 %643 }
 0x19a   : > { %v896_v24 = vsel %vm715_vm1, %v644_v51, 0.0  ;;  %v2333_v51 = vld [vmem:[%s2526_s20 + $0x30] sm:$0xff] }
 0x19c   : > { %846 = vadd.xlane.f32.xlu1 %v845_v32  ;;  %843 = vadd.xlane.f32.xlu0 %v842_v58  ;;  %v642_v28 = vpop.permute.xlu1 %641 }
 0x19d   : > { %v893_v29 = vsel %vm715_vm1, %v642_v28, 0.0  ;;  %v648_v34 = vpop.permute.xlu0 %647 }
 0x19e   : > { %v902_v2 = vsel %vm715_vm1, %v648_v34, 0.0  ;;  %v2334_v34 = vld [vmem:[%s2526_s20 + $0x48] sm:$0xff] }
 0x1a0   : > { %852 = vadd.xlane.f32.xlu1 %v851_v59  ;;  %849 = vadd.xlane.f32.xlu0 %v848_v48  ;;  %v646_v11 = vpop.permute.xlu1 %645 }
 0x1a1   : > { %v899_v50 = vsel %vm715_vm1, %v646_v11, 0.0 }
 0x1a4   : > { %858 = vadd.xlane.f32.xlu1 %v857_v49  ;;  %855 = vadd.xlane.f32.xlu0 %v854_v54  ;;  %v650_v20 = vpop.permute.xlu1 %649 }
 0x1a5   : > { %v905_v57 = vsel %vm715_vm1, %v650_v20, 0.0 }
 0x1a8   : > { %864 = vadd.xlane.f32.xlu1 %v863_v17  ;;  %861 = vadd.xlane.f32.xlu0 %v860_v10 }
 0x1ac   : > { %870 = vadd.xlane.f32.xlu1 %v869_v22  ;;  %867 = vadd.xlane.f32.xlu0 %v866_v31 }
 0x1b0   : > { %876 = vadd.xlane.f32.xlu1 %v875_v21  ;;  %873 = vadd.xlane.f32.xlu0 %v872_v45 }
 0x1b4   : > { %882 = vadd.xlane.f32.xlu1 %v881_v1  ;;  %879 = vadd.xlane.f32.xlu0 %v878_v23 }
 0x1b8   : > { %888 = vadd.xlane.f32.xlu1 %v887_v30  ;;  %885 = vadd.xlane.f32.xlu0 %v884_v12 }
 0x1bc   : > { %894 = vadd.xlane.f32.xlu1 %v893_v29  ;;  %891 = vadd.xlane.f32.xlu0 %v890_v61 }
 0x1c0   : > { %900 = vadd.xlane.f32.xlu1 %v899_v50  ;;  %897 = vadd.xlane.f32.xlu0 %v896_v24 }
 0x1c4   : > { %906 = vadd.xlane.f32.xlu1 %v905_v57  ;;  %903 = vadd.xlane.f32.xlu0 %v902_v2 }
 0x1cd   : > { %v718_v7 = vpop.xlane.xlu0 %717 }
 0x1ce   : > { %v1036_v35 = vmax.f32 %v718_v7, 1e-24  ;;  %v2335_v7 = vld [vmem:[%s2526_s20 + $0x40] sm:$0xff] }
 0x1d0   : > { %2198 = vrsqrt.f32 %v1036_v35 }
 0x1d1   : > { %v724_v25 = vpop.xlane.xlu0 %723 }
 0x1d2   : > { %v1038_v56 = vmax.f32 %v724_v25, 1e-24 }
 0x1d4   : > { %2200 = vrsqrt.f32 %v1038_v56 }
 0x1d5   : > { %v721_v40 = vpop.xlane.xlu1 %720  ;;  %v727_v27 = vpop.xlane.xlu0 %726 }
 0x1d6   : > { %v1037_v42 = vmax.f32 %v721_v40, 1e-24  ;;  %v1039_v63 = vmax.f32 %v727_v27, 1e-24 }
 0x1d8   : > { %2202 = vrsqrt.f32 %v1037_v42  ;;  %v2336_v42 = vld [vmem:[%s2526_s20 + $0x58] sm:$0xff] }
 0x1d9   : > { %2204 = vrsqrt.f32 %v1039_v63  ;;  %v733_v6 = vpop.xlane.xlu1 %732  ;;  %v730_v41 = vpop.xlane.xlu0 %729 }
 0x1da   : > { %v1041_v3 = vmax.f32 %v733_v6, 1e-24  ;;  %v1040_v62 = vmax.f32 %v730_v41, 1e-24 }
 0x1dc   : > { %2206 = vrsqrt.f32 %v1041_v3  ;;  %v2337_v3 = vld [vmem:[%s2526_s20 + $0x50] sm:$0xff] }
 0x1dd   : > { %v2199_v46 = vpop.eup %2198  ;;  %2208 = vrsqrt.f32 %v1040_v62  ;;  %v739_v26 = vpop.xlane.xlu1 %738 }
 0x1de   : > { %v736_v8 = vpop.xlane.xlu0 %735  ;;  %v1292_v43 = vmul.f32 %v2326_v19, %v2199_v46  ;;  %v1043_v47 = vmax.f32 %v739_v26, 1e-24 }
 0x1df   : > { %v1042_v4 = vmax.f32 %v736_v8, 1e-24 }
 0x1e0   : > { %1357 = vst.msk [vmem:[%s3121_s24] sm:$0xff] %vm1356_vm2, %v1292_v43  ;;  %2210 = vrsqrt.f32 %v1043_v47  ;;  %v2338_v43 = vld [vmem:[%s2526_s20 + $0x68] sm:$0xff] }
 0x1e1   : > { %v2201_v18 = vpop.eup %2200  ;;  %1422 = vst.msk [vmem:[%s3121_s24] sm:$0xff] %vm1421_vm3, %v2326_v19  ;;  %2212 = vrsqrt.f32 %v1042_v4  ;;  %v745_v52 = vpop.xlane.xlu1 %744 }
 0x1e2   : > { %v742_v33 = vpop.xlane.xlu0 %741  ;;  %v1294_v37 = vmul.f32 %v2327_v60, %v2201_v18  ;;  %v1045_v9 = vmax.f32 %v745_v52, 1e-24  ;;  %v2339_v52 = vld [vmem:[%s2526_s20 + $0x60] sm:$0xff] }
 0x1e3   : > { %v1044_v53 = vmax.f32 %v742_v33, 1e-24 }
 0x1e4   : > { %1359 = vst.msk [vmem:[%s3121_s24 + $0x10] sm:$0xff] %vm1356_vm2, %v1294_v37  ;;  %2214 = vrsqrt.f32 %v1045_v9 }
 0x1e5   : > { %v2203_v13 = vpop.eup %2202  ;;  %1424 = vst.msk [vmem:[%s3121_s24 + $0x10] sm:$0xff] %vm1421_vm3, %v2327_v60  ;;  %2216 = vrsqrt.f32 %v1044_v53  ;;  %v751_v36 = vpop.xlane.xlu1 %750 }
 0x1e6   : > { %v748_v58 = vpop.xlane.xlu0 %747  ;;  %v2205_v32 = vpop.eup %2204  ;;  %v1293_v55 = vmul.f32 %v2328_v16, %v2203_v13  ;;  %v1047_v48 = vmax.f32 %v751_v36, 1e-24  ;;  %v2340_v13 = vld [vmem:[%s2526_s20 + $0x78] sm:$0xff] }
 0x1e7   : > { %v1046_v59 = vmax.f32 %v748_v58, 1e-24  ;;  %v1295_v39 = vmul.f32 %v2329_v5, %v2205_v32 }
 0x1e8   : > { %1358 = vst.msk [vmem:[%s3121_s24 + $0x8] sm:$0xff] %vm1356_vm2, %v1293_v55  ;;  %2218 = vrsqrt.f32 %v1047_v48 }
 0x1e9   : > { %v2207_v54 = vpop.eup %2206  ;;  %1423 = vst.msk [vmem:[%s3121_s24 + $0x8] sm:$0xff] %vm1421_vm3, %v2328_v16  ;;  %2220 = vrsqrt.f32 %v1046_v59  ;;  %v757_v49 = vpop.xlane.xlu1 %756  ;;  %v2341_v16 = vld [vmem:[%s2526_s20 + $0x70] sm:$0xff] }
 0x1ea   : > { %1360 = vst.msk [vmem:[%s3121_s24 + $0x18] sm:$0xff] %vm1356_vm2, %v1295_v39  ;;  %v754_v10 = vpop.xlane.xlu0 %753  ;;  %v2209_v17 = vpop.eup %2208  ;;  %v1297_v38 = vmul.f32 %v2330_v14, %v2207_v54  ;;  %v1049_v31 = vmax.f32 %v757_v49, 1e-24  ;;  %v2342_v54 = vld [vmem:[%s2526_s20 + $0x88] sm:$0xff] }
 0x1eb   : > { %1425 = vst.msk [vmem:[%s3121_s24 + $0x18] sm:$0xff] %vm1421_vm3, %v2329_v5  ;;  %v1048_v22 = vmax.f32 %v754_v10, 1e-24  ;;  %v1296_v15 = vmul.f32 %v2331_v0, %v2209_v17 }
 0x1ec   : > { %1362 = vst.msk [vmem:[%s3121_s24 + $0x28] sm:$0xff] %vm1356_vm2, %v1297_v38  ;;  %2222 = vrsqrt.f32 %v1049_v31 }
 0x1ed   : > { %v2211_v45 = vpop.eup %2210  ;;  %1427 = vst.msk [vmem:[%s3121_s24 + $0x28] sm:$0xff] %vm1421_vm3, %v2330_v14  ;;  %2224 = vrsqrt.f32 %v1048_v22  ;;  %v763_v21 = vpop.xlane.xlu1 %762  ;;  %v2343_v14 = vld [vmem:[%s2526_s20 + $0x80] sm:$0xff] }
 0x1ee   : > { %1361 = vst.msk [vmem:[%s3121_s24 + $0x20] sm:$0xff] %vm1356_vm2, %v1296_v15  ;;  %v760_v23 = vpop.xlane.xlu0 %759  ;;  %v2213_v1 = vpop.eup %2212  ;;  %v1299_v28 = vmul.f32 %v2332_v44, %v2211_v45  ;;  %v1051_v12 = vmax.f32 %v763_v21, 1e-24  ;;  %v2344_v45 = vld [vmem:[%s2526_s20 + $0x98] sm:$0xff] }
 0x1ef   : > { %1426 = vst.msk [vmem:[%s3121_s24 + $0x20] sm:$0xff] %vm1421_vm3, %v2331_v0  ;;  %v1050_v30 = vmax.f32 %v760_v23, 1e-24  ;;  %v1298_v11 = vmul.f32 %v2333_v51, %v2213_v1 }
 0x1f0   : > { %1364 = vst.msk [vmem:[%s3121_s24 + $0x38] sm:$0xff] %vm1356_vm2, %v1299_v28  ;;  %2226 = vrsqrt.f32 %v1051_v12 }
 0x1f1   : > { %v2215_v61 = vpop.eup %2214  ;;  %1429 = vst.msk [vmem:[%s3121_s24 + $0x38] sm:$0xff] %vm1421_vm3, %v2332_v44  ;;  %2228 = vrsqrt.f32 %v1050_v30  ;;  %v769_v29 = vpop.xlane.xlu1 %768  ;;  %v2345_v44 = vld [vmem:[%s2526_s20 + $0x90] sm:$0xff] }
 0x1f2   : > { %1363 = vst.msk [vmem:[%s3121_s24 + $0x30] sm:$0xff] %vm1356_vm2, %v1298_v11  ;;  %v766_v24 = vpop.xlane.xlu0 %765  ;;  %v2217_v50 = vpop.eup %2216  ;;  %v1301_v20 = vmul.f32 %v2334_v34, %v2215_v61  ;;  %v1053_v2 = vmax.f32 %v769_v29, 1e-24  ;;  %v2346_v61 = vld [vmem:[%s2526_s20 + $0xa8] sm:$0xff] }
 0x1f3   : > { %1428 = vst.msk [vmem:[%s3121_s24 + $0x30] sm:$0xff] %vm1421_vm3, %v2333_v51  ;;  %v1052_v57 = vmax.f32 %v766_v24, 1e-24  ;;  %v1300_v35 = vmul.f32 %v2335_v7, %v2217_v50 }
 0x1f4   : > { %1366 = vst.msk [vmem:[%s3121_s24 + $0x48] sm:$0xff] %vm1356_vm2, %v1301_v20  ;;  %2230 = vrsqrt.f32 %v1053_v2 }
 0x1f5   : > { %v2219_v25 = vpop.eup %2218  ;;  %1431 = vst.msk [vmem:[%s3121_s24 + $0x48] sm:$0xff] %vm1421_vm3, %v2334_v34  ;;  %2232 = vrsqrt.f32 %v1052_v57  ;;  %v775_v56 = vpop.xlane.xlu1 %774  ;;  %v2347_v34 = vld [vmem:[%s2526_s20 + $0xa0] sm:$0xff] }
 0x1f6   : > { %1365 = vst.msk [vmem:[%s3121_s24 + $0x40] sm:$0xff] %vm1356_vm2, %v1300_v35  ;;  %v772_v40 = vpop.xlane.xlu0 %771  ;;  %v2221_v27 = vpop.eup %2220  ;;  %v1303_v63 = vmul.f32 %v2336_v42, %v2219_v25  ;;  %v1055_v6 = vmax.f32 %v775_v56, 1e-24  ;;  %v2348_v25 = vld [vmem:[%s2526_s20 + $0xb8] sm:$0xff] }
 0x1f7   : > { %1430 = vst.msk [vmem:[%s3121_s24 + $0x40] sm:$0xff] %vm1421_vm3, %v2335_v7  ;;  %v1054_v41 = vmax.f32 %v772_v40, 1e-24  ;;  %v1302_v62 = vmul.f32 %v2337_v3, %v2221_v27 }
 0x1f8   : > { %1368 = vst.msk [vmem:[%s3121_s24 + $0x58] sm:$0xff] %vm1356_vm2, %v1303_v63  ;;  %2234 = vrsqrt.f32 %v1055_v6 }
 0x1f9   : > { %v2223_v46 = vpop.eup %2222  ;;  %1433 = vst.msk [vmem:[%s3121_s24 + $0x58] sm:$0xff] %vm1421_vm3, %v2336_v42  ;;  %2236 = vrsqrt.f32 %v1054_v41  ;;  %v781_v26 = vpop.xlane.xlu1 %780  ;;  %v2349_v42 = vld [vmem:[%s2526_s20 + $0xb0] sm:$0xff] }
 0x1fa   : > { %1367 = vst.msk [vmem:[%s3121_s24 + $0x50] sm:$0xff] %vm1356_vm2, %v1302_v62  ;;  %v778_v8 = vpop.xlane.xlu0 %777  ;;  %v2225_v19 = vpop.eup %2224  ;;  %v1305_v47 = vmul.f32 %v2338_v43, %v2223_v46  ;;  %v1057_v4 = vmax.f32 %v781_v26, 1e-24  ;;  %v2350_v46 = vld [vmem:[%s2526_s20 + $0xc8] sm:$0xff] }
 0x1fb   : > { %1432 = vst.msk [vmem:[%s3121_s24 + $0x50] sm:$0xff] %vm1421_vm3, %v2337_v3  ;;  %v1056_v18 = vmax.f32 %v778_v8, 1e-24  ;;  %v1304_v33 = vmul.f32 %v2339_v52, %v2225_v19 }
 0x1fc   : > { %1370 = vst.msk [vmem:[%s3121_s24 + $0x68] sm:$0xff] %vm1356_vm2, %v1305_v47  ;;  %2238 = vrsqrt.f32 %v1057_v4 }
 0x1fd   : > { %v2227_v60 = vpop.eup %2226  ;;  %1435 = vst.msk [vmem:[%s3121_s24 + $0x68] sm:$0xff] %vm1421_vm3, %v2338_v43  ;;  %2240 = vrsqrt.f32 %v1056_v18  ;;  %v787_v37 = vpop.xlane.xlu1 %786  ;;  %v2351_v43 = vld [vmem:[%s2526_s20 + $0xc0] sm:$0xff] }
 0x1fe   : > { %1369 = vst.msk [vmem:[%s3121_s24 + $0x60] sm:$0xff] %vm1356_vm2, %v1304_v33  ;;  %v784_v9 = vpop.xlane.xlu0 %783  ;;  %v2229_v53 = vpop.eup %2228  ;;  %v1307_v36 = vmul.f32 %v2340_v13, %v2227_v60  ;;  %v1059_v58 = vmax.f32 %v787_v37, 1e-24  ;;  %v2352_v60 = vld [vmem:[%s2526_s20 + $0xd8] sm:$0xff] }
 0x1ff   : > { %1434 = vst.msk [vmem:[%s3121_s24 + $0x60] sm:$0xff] %vm1421_vm3, %v2339_v52  ;;  %v1058_v32 = vmax.f32 %v784_v9, 1e-24  ;;  %v1306_v55 = vmul.f32 %v2341_v16, %v2229_v53 }
 0x200   : > { %1372 = vst.msk [vmem:[%s3121_s24 + $0x78] sm:$0xff] %vm1356_vm2, %v1307_v36  ;;  %2242 = vrsqrt.f32 %v1059_v58 }
 0x201   : > { %v2231_v48 = vpop.eup %2230  ;;  %1437 = vst.msk [vmem:[%s3121_s24 + $0x78] sm:$0xff] %vm1421_vm3, %v2340_v13  ;;  %2244 = vrsqrt.f32 %v1058_v32  ;;  %v793_v59 = vpop.xlane.xlu1 %792  ;;  %v2353_v13 = vld [vmem:[%s2526_s20 + $0xd0] sm:$0xff] }
 0x202   : > { %1371 = vst.msk [vmem:[%s3121_s24 + $0x70] sm:$0xff] %vm1356_vm2, %v1306_v55  ;;  %v790_v5 = vpop.xlane.xlu0 %789  ;;  %v2233_v39 = vpop.eup %2232  ;;  %v1309_v49 = vmul.f32 %v2342_v54, %v2231_v48  ;;  %v1061_v10 = vmax.f32 %v793_v59, 1e-24  ;;  %v2354_v48 = vld [vmem:[%s2526_s20 + $0xe8] sm:$0xff] }
 0x203   : > { %1436 = vst.msk [vmem:[%s3121_s24 + $0x70] sm:$0xff] %vm1421_vm3, %v2341_v16  ;;  %v1060_v17 = vmax.f32 %v790_v5, 1e-24  ;;  %v1308_v38 = vmul.f32 %v2343_v14, %v2233_v39 }
 0x204   : > { %1374 = vst.msk [vmem:[%s3121_s24 + $0x88] sm:$0xff] %vm1356_vm2, %v1309_v49  ;;  %2246 = vrsqrt.f32 %v1061_v10 }
 0x205   : > { %v2235_v31 = vpop.eup %2234  ;;  %1439 = vst.msk [vmem:[%s3121_s24 + $0x88] sm:$0xff] %vm1421_vm3, %v2342_v54  ;;  %2248 = vrsqrt.f32 %v1060_v17  ;;  %v799_v22 = vpop.xlane.xlu1 %798  ;;  %v2355_v54 = vld [vmem:[%s2526_s20 + $0xe0] sm:$0xff] }
 0x206   : > { %1373 = vst.msk [vmem:[%s3121_s24 + $0x80] sm:$0xff] %vm1356_vm2, %v1308_v38  ;;  %v796_v0 = vpop.xlane.xlu0 %795  ;;  %v2237_v15 = vpop.eup %2236  ;;  %v1311_v21 = vmul.f32 %v2344_v45, %v2235_v31  ;;  %v1063_v23 = vmax.f32 %v799_v22, 1e-24  ;;  %v2356_v31 = vld [vmem:[%s2526_s20 + $0xf8] sm:$0xff] }
 0x207   : > { %1438 = vst.msk [vmem:[%s3121_s24 + $0x80] sm:$0xff] %vm1421_vm3, %v2343_v14  ;;  %v1062_v1 = vmax.f32 %v796_v0, 1e-24  ;;  %v1310_v28 = vmul.f32 %v2345_v44, %v2237_v15 }
 0x208   : > { %1376 = vst.msk [vmem:[%s3121_s24 + $0x98] sm:$0xff] %vm1356_vm2, %v1311_v21  ;;  %2250 = vrsqrt.f32 %v1063_v23 }
 0x209   : > { %v2239_v12 = vpop.eup %2238  ;;  %1441 = vst.msk [vmem:[%s3121_s24 + $0x98] sm:$0xff] %vm1421_vm3, %v2344_v45  ;;  %2252 = vrsqrt.f32 %v1062_v1  ;;  %v805_v30 = vpop.xlane.xlu1 %804  ;;  %v2357_v45 = vld [vmem:[%s2526_s20 + $0xf0] sm:$0xff] }
 0x20a   : > { %1375 = vst.msk [vmem:[%s3121_s24 + $0x90] sm:$0xff] %vm1356_vm2, %v1310_v28  ;;  %v802_v51 = vpop.xlane.xlu0 %801  ;;  %v2241_v11 = vpop.eup %2240  ;;  %v1313_v29 = vmul.f32 %v2346_v61, %v2239_v12  ;;  %v1065_v24 = vmax.f32 %v805_v30, 1e-24  ;;  %v2358_v12 = vld [vmem:[%s2526_s20 + $0x108] sm:$0xff] }
 0x20b   : > { %1440 = vst.msk [vmem:[%s3121_s24 + $0x90] sm:$0xff] %vm1421_vm3, %v2345_v44  ;;  %v1064_v50 = vmax.f32 %v802_v51, 1e-24  ;;  %v1312_v20 = vmul.f32 %v2347_v34, %v2241_v11 }
 0x20c   : > { %1378 = vst.msk [vmem:[%s3121_s24 + $0xa8] sm:$0xff] %vm1356_vm2, %v1313_v29  ;;  %2254 = vrsqrt.f32 %v1065_v24 }
 0x20d   : > { %v2243_v2 = vpop.eup %2242  ;;  %1443 = vst.msk [vmem:[%s3121_s24 + $0xa8] sm:$0xff] %vm1421_vm3, %v2346_v61  ;;  %2256 = vrsqrt.f32 %v1064_v50  ;;  %v811_v57 = vpop.xlane.xlu1 %810  ;;  %v2359_v61 = vld [vmem:[%s2526_s20 + $0x100] sm:$0xff] }
 0x20e   : > { %1377 = vst.msk [vmem:[%s3121_s24 + $0xa0] sm:$0xff] %vm1356_vm2, %v1312_v20  ;;  %v808_v7 = vpop.xlane.xlu0 %807  ;;  %v2245_v35 = vpop.eup %2244  ;;  %v1315_v56 = vmul.f32 %v2348_v25, %v2243_v2  ;;  %v1067_v40 = vmax.f32 %v811_v57, 1e-24  ;;  %v2360_v2 = vld [vmem:[%s2526_s20 + $0x118] sm:$0xff] }
 0x20f   : > { %1442 = vst.msk [vmem:[%s3121_s24 + $0xa0] sm:$0xff] %vm1421_vm3, %v2347_v34  ;;  %v1066_v27 = vmax.f32 %v808_v7, 1e-24  ;;  %v1314_v63 = vmul.f32 %v2349_v42, %v2245_v35 }
 0x210   : > { %1380 = vst.msk [vmem:[%s3121_s24 + $0xb8] sm:$0xff] %vm1356_vm2, %v1315_v56  ;;  %2258 = vrsqrt.f32 %v1067_v40 }
 0x211   : > { %v2247_v6 = vpop.eup %2246  ;;  %1445 = vst.msk [vmem:[%s3121_s24 + $0xb8] sm:$0xff] %vm1421_vm3, %v2348_v25  ;;  %2260 = vrsqrt.f32 %v1066_v27  ;;  %v817_v41 = vpop.xlane.xlu1 %816  ;;  %v2361_v25 = vld [vmem:[%s2526_s20 + $0x110] sm:$0xff] }
 0x212   : > { %1379 = vst.msk [vmem:[%s3121_s24 + $0xb0] sm:$0xff] %vm1356_vm2, %v1314_v63  ;;  %v814_v3 = vpop.xlane.xlu0 %813  ;;  %v2249_v62 = vpop.eup %2248  ;;  %v1317_v26 = vmul.f32 %v2350_v46, %v2247_v6  ;;  %v1069_v8 = vmax.f32 %v817_v41, 1e-24  ;;  %v2362_v6 = vld [vmem:[%s2526_s20 + $0x128] sm:$0xff] }
 0x213   : > { %1444 = vst.msk [vmem:[%s3121_s24 + $0xb0] sm:$0xff] %vm1421_vm3, %v2349_v42  ;;  %v1068_v19 = vmax.f32 %v814_v3, 1e-24  ;;  %v1316_v47 = vmul.f32 %v2351_v43, %v2249_v62 }
 0x214   : > { %1382 = vst.msk [vmem:[%s3121_s24 + $0xc8] sm:$0xff] %vm1356_vm2, %v1317_v26  ;;  %2262 = vrsqrt.f32 %v1069_v8 }
 0x215   : > { %v2251_v4 = vpop.eup %2250  ;;  %1447 = vst.msk [vmem:[%s3121_s24 + $0xc8] sm:$0xff] %vm1421_vm3, %v2350_v46  ;;  %2264 = vrsqrt.f32 %v1068_v19  ;;  %v823_v18 = vpop.xlane.xlu1 %822  ;;  %v2363_v46 = vld [vmem:[%s2526_s20 + $0x120] sm:$0xff] }
 0x216   : > { %1381 = vst.msk [vmem:[%s3121_s24 + $0xc0] sm:$0xff] %vm1356_vm2, %v1316_v47  ;;  %v820_v52 = vpop.xlane.xlu0 %819  ;;  %v2253_v33 = vpop.eup %2252  ;;  %v1319_v37 = vmul.f32 %v2352_v60, %v2251_v4  ;;  %v1071_v9 = vmax.f32 %v823_v18, 1e-24  ;;  %v2364_v4 = vld [vmem:[%s2526_s20 + $0x138] sm:$0xff] }
 0x217   : > { %1446 = vst.msk [vmem:[%s3121_s24 + $0xc0] sm:$0xff] %vm1421_vm3, %v2351_v43  ;;  %v1070_v53 = vmax.f32 %v820_v52, 1e-24  ;;  %v1318_v36 = vmul.f32 %v2353_v13, %v2253_v33 }
 0x218   : > { %1384 = vst.msk [vmem:[%s3121_s24 + $0xd8] sm:$0xff] %vm1356_vm2, %v1319_v37  ;;  %2266 = vrsqrt.f32 %v1071_v9 }
 0x219   : > { %v2255_v58 = vpop.eup %2254  ;;  %1449 = vst.msk [vmem:[%s3121_s24 + $0xd8] sm:$0xff] %vm1421_vm3, %v2352_v60  ;;  %2268 = vrsqrt.f32 %v1070_v53  ;;  %v829_v32 = vpop.xlane.xlu1 %828  ;;  %v2365_v60 = vld [vmem:[%s2526_s20 + $0x130] sm:$0xff] }
 0x21a   : > { %1383 = vst.msk [vmem:[%s3121_s24 + $0xd0] sm:$0xff] %vm1356_vm2, %v1318_v36  ;;  %v826_v16 = vpop.xlane.xlu0 %825  ;;  %v2257_v55 = vpop.eup %2256  ;;  %v1321_v59 = vmul.f32 %v2354_v48, %v2255_v58  ;;  %v1073_v5 = vmax.f32 %v829_v32, 1e-24  ;;  %v2366_v58 = vld [vmem:[%s2526_s20 + $0x148] sm:$0xff] }
 0x21b   : > { %1448 = vst.msk [vmem:[%s3121_s24 + $0xd0] sm:$0xff] %vm1421_vm3, %v2353_v13  ;;  %v1072_v39 = vmax.f32 %v826_v16, 1e-24  ;;  %v1320_v49 = vmul.f32 %v2355_v54, %v2257_v55 }
 0x21c   : > { %1386 = vst.msk [vmem:[%s3121_s24 + $0xe8] sm:$0xff] %vm1356_vm2, %v1321_v59  ;;  %2270 = vrsqrt.f32 %v1073_v5 }
 0x21d   : > { %v2259_v10 = vpop.eup %2258  ;;  %1451 = vst.msk [vmem:[%s3121_s24 + $0xe8] sm:$0xff] %vm1421_vm3, %v2354_v48  ;;  %2272 = vrsqrt.f32 %v1072_v39  ;;  %v835_v17 = vpop.xlane.xlu1 %834  ;;  %v2367_v48 = vld [vmem:[%s2526_s20 + $0x140] sm:$0xff] }
 0x21e   : > { %1385 = vst.msk [vmem:[%s3121_s24 + $0xe0] sm:$0xff] %vm1356_vm2, %v1320_v49  ;;  %v832_v14 = vpop.xlane.xlu0 %831  ;;  %v2261_v38 = vpop.eup %2260  ;;  %v1323_v22 = vmul.f32 %v2356_v31, %v2259_v10  ;;  %v1075_v0 = vmax.f32 %v835_v17, 1e-24  ;;  %v2368_v10 = vld [vmem:[%s2526_s20 + $0x158] sm:$0xff] }
 0x21f   : > { %1450 = vst.msk [vmem:[%s3121_s24 + $0xe0] sm:$0xff] %vm1421_vm3, %v2355_v54  ;;  %v1074_v15 = vmax.f32 %v832_v14, 1e-24  ;;  %v1322_v21 = vmul.f32 %v2357_v45, %v2261_v38 }
 0x220   : > { %1388 = vst.msk [vmem:[%s3121_s24 + $0xf8] sm:$0xff] %vm1356_vm2, %v1323_v22  ;;  %2274 = vrsqrt.f32 %v1075_v0 }
 0x221   : > { %v2263_v23 = vpop.eup %2262  ;;  %1453 = vst.msk [vmem:[%s3121_s24 + $0xf8] sm:$0xff] %vm1421_vm3, %v2356_v31  ;;  %2276 = vrsqrt.f32 %v1074_v15  ;;  %v841_v1 = vpop.xlane.xlu1 %840  ;;  %v2369_v31 = vld [vmem:[%s2526_s20 + $0x150] sm:$0xff] }
 0x222   : > { %1387 = vst.msk [vmem:[%s3121_s24 + $0xf0] sm:$0xff] %vm1356_vm2, %v1322_v21  ;;  %v838_v44 = vpop.xlane.xlu0 %837  ;;  %v2265_v28 = vpop.eup %2264  ;;  %v1325_v30 = vmul.f32 %v2358_v12, %v2263_v23  ;;  %v1077_v51 = vmax.f32 %v841_v1, 1e-24  ;;  %v2370_v23 = vld [vmem:[%s2526_s20 + $0x168] sm:$0xff] }
 0x223   : > { %1452 = vst.msk [vmem:[%s3121_s24 + $0xf0] sm:$0xff] %vm1421_vm3, %v2357_v45  ;;  %v1076_v11 = vmax.f32 %v838_v44, 1e-24  ;;  %v1324_v29 = vmul.f32 %v2359_v61, %v2265_v28 }
 0x224   : > { %1390 = vst.msk [vmem:[%s3121_s24 + $0x108] sm:$0xff] %vm1356_vm2, %v1325_v30  ;;  %2278 = vrsqrt.f32 %v1077_v51 }
 0x225   : > { %v2267_v24 = vpop.eup %2266  ;;  %1455 = vst.msk [vmem:[%s3121_s24 + $0x108] sm:$0xff] %vm1421_vm3, %v2358_v12  ;;  %2280 = vrsqrt.f32 %v1076_v11  ;;  %v847_v50 = vpop.xlane.xlu1 %846  ;;  %v2371_v12 = vld [vmem:[%s2526_s20 + $0x160] sm:$0xff] }
 0x226   : > { %1389 = vst.msk [vmem:[%s3121_s24 + $0x100] sm:$0xff] %vm1356_vm2, %v1324_v29  ;;  %v844_v34 = vpop.xlane.xlu0 %843  ;;  %v2269_v20 = vpop.eup %2268  ;;  %v1327_v57 = vmul.f32 %v2360_v2, %v2267_v24  ;;  %v1079_v7 = vmax.f32 %v847_v50, 1e-24  ;;  %v2372_v24 = vld [vmem:[%s2526_s20 + $0x178] sm:$0xff] }
 0x227   : > { %1454 = vst.msk [vmem:[%s3121_s24 + $0x100] sm:$0xff] %vm1421_vm3, %v2359_v61  ;;  %v1078_v35 = vmax.f32 %v844_v34, 1e-24  ;;  %v1326_v56 = vmul.f32 %v2361_v25, %v2269_v20 }
 0x228   : > { %1392 = vst.msk [vmem:[%s3121_s24 + $0x118] sm:$0xff] %vm1356_vm2, %v1327_v57  ;;  %2282 = vrsqrt.f32 %v1079_v7 }
 0x229   : > { %v2271_v40 = vpop.eup %2270  ;;  %1457 = vst.msk [vmem:[%s3121_s24 + $0x118] sm:$0xff] %vm1421_vm3, %v2360_v2  ;;  %2284 = vrsqrt.f32 %v1078_v35  ;;  %v853_v27 = vpop.xlane.xlu1 %852  ;;  %v2373_v2 = vld [vmem:[%s2526_s20 + $0x170] sm:$0xff] }
 0x22a   : > { %1391 = vst.msk [vmem:[%s3121_s24 + $0x110] sm:$0xff] %vm1356_vm2, %v1326_v56  ;;  %v850_v42 = vpop.xlane.xlu0 %849  ;;  %v2273_v63 = vpop.eup %2272  ;;  %v1329_v41 = vmul.f32 %v2362_v6, %v2271_v40  ;;  %v1081_v3 = vmax.f32 %v853_v27, 1e-24  ;;  %v2374_v40 = vld [vmem:[%s2526_s20 + $0x188] sm:$0xff] }
 0x22b   : > { %1456 = vst.msk [vmem:[%s3121_s24 + $0x110] sm:$0xff] %vm1421_vm3, %v2361_v25  ;;  %v1080_v62 = vmax.f32 %v850_v42, 1e-24  ;;  %v1328_v26 = vmul.f32 %v2363_v46, %v2273_v63 }
 0x22c   : > { %1394 = vst.msk [vmem:[%s3121_s24 + $0x128] sm:$0xff] %vm1356_vm2, %v1329_v41  ;;  %2286 = vrsqrt.f32 %v1081_v3 }
 0x22d   : > { %v2275_v8 = vpop.eup %2274  ;;  %1459 = vst.msk [vmem:[%s3121_s24 + $0x128] sm:$0xff] %vm1421_vm3, %v2362_v6  ;;  %2288 = vrsqrt.f32 %v1080_v62  ;;  %v859_v19 = vpop.xlane.xlu1 %858  ;;  %v2375_v6 = vld [vmem:[%s2526_s20 + $0x180] sm:$0xff] }
 0x22e   : > { %1393 = vst.msk [vmem:[%s3121_s24 + $0x120] sm:$0xff] %vm1356_vm2, %v1328_v26  ;;  %v856_v43 = vpop.xlane.xlu0 %855  ;;  %v2277_v47 = vpop.eup %2276  ;;  %v1331_v18 = vmul.f32 %v2364_v4, %v2275_v8  ;;  %v1083_v52 = vmax.f32 %v859_v19, 1e-24  ;;  %v2376_v8 = vld [vmem:[%s2526_s20 + $0x198] sm:$0xff] }
 0x22f   : > { %1458 = vst.msk [vmem:[%s3121_s24 + $0x120] sm:$0xff] %vm1421_vm3, %v2363_v46  ;;  %v1082_v33 = vmax.f32 %v856_v43, 1e-24  ;;  %v1330_v37 = vmul.f32 %v2365_v60, %v2277_v47 }
 0x230   : > { %1396 = vst.msk [vmem:[%s3121_s24 + $0x138] sm:$0xff] %vm1356_vm2, %v1331_v18  ;;  %2290 = vrsqrt.f32 %v1083_v52 }
 0x231   : > { %v2279_v9 = vpop.eup %2278  ;;  %1461 = vst.msk [vmem:[%s3121_s24 + $0x138] sm:$0xff] %vm1421_vm3, %v2364_v4  ;;  %2292 = vrsqrt.f32 %v1082_v33  ;;  %v865_v53 = vpop.xlane.xlu1 %864  ;;  %v2377_v4 = vld [vmem:[%s2526_s20 + $0x190] sm:$0xff] }
 0x232   : > { %1395 = vst.msk [vmem:[%s3121_s24 + $0x130] sm:$0xff] %vm1356_vm2, %v1330_v37  ;;  %v862_v13 = vpop.xlane.xlu0 %861  ;;  %v2281_v36 = vpop.eup %2280  ;;  %v1333_v32 = vmul.f32 %v2366_v58, %v2279_v9  ;;  %v1085_v16 = vmax.f32 %v865_v53, 1e-24  ;;  %v2378_v9 = vld [vmem:[%s2526_s20 + $0x1a8] sm:$0xff] }
 0x233   : > { %1460 = vst.msk [vmem:[%s3121_s24 + $0x130] sm:$0xff] %vm1421_vm3, %v2365_v60  ;;  %v1084_v55 = vmax.f32 %v862_v13, 1e-24  ;;  %v1332_v59 = vmul.f32 %v2367_v48, %v2281_v36 }
 0x234   : > { %1398 = vst.msk [vmem:[%s3121_s24 + $0x148] sm:$0xff] %vm1356_vm2, %v1333_v32  ;;  %2294 = vrsqrt.f32 %v1085_v16 }
 0x235   : > { %v2283_v5 = vpop.eup %2282  ;;  %1463 = vst.msk [vmem:[%s3121_s24 + $0x148] sm:$0xff] %vm1421_vm3, %v2366_v58  ;;  %2296 = vrsqrt.f32 %v1084_v55  ;;  %v871_v39 = vpop.xlane.xlu1 %870  ;;  %v2379_v58 = vld [vmem:[%s2526_s20 + $0x1a0] sm:$0xff] }
 0x236   : > { %1397 = vst.msk [vmem:[%s3121_s24 + $0x140] sm:$0xff] %vm1356_vm2, %v1332_v59  ;;  %v868_v54 = vpop.xlane.xlu0 %867  ;;  %v2285_v49 = vpop.eup %2284  ;;  %v1335_v17 = vmul.f32 %v2368_v10, %v2283_v5  ;;  %v1087_v14 = vmax.f32 %v871_v39, 1e-24  ;;  %v2380_v5 = vld [vmem:[%s2526_s20 + $0x1b8] sm:$0xff] }
 0x237   : > { %1462 = vst.msk [vmem:[%s3121_s24 + $0x140] sm:$0xff] %vm1421_vm3, %v2367_v48  ;;  %v1086_v38 = vmax.f32 %v868_v54, 1e-24  ;;  %v1334_v22 = vmul.f32 %v2369_v31, %v2285_v49 }
 0x238   : > { %1400 = vst.msk [vmem:[%s3121_s24 + $0x158] sm:$0xff] %vm1356_vm2, %v1335_v17  ;;  %2298 = vrsqrt.f32 %v1087_v14 }
 0x239   : > { %v2287_v0 = vpop.eup %2286  ;;  %1465 = vst.msk [vmem:[%s3121_s24 + $0x158] sm:$0xff] %vm1421_vm3, %v2368_v10  ;;  %2300 = vrsqrt.f32 %v1086_v38  ;;  %v877_v15 = vpop.xlane.xlu1 %876  ;;  %v2381_v10 = vld [vmem:[%s2526_s20 + $0x1b0] sm:$0xff] }
 0x23a   : > { %1399 = vst.msk [vmem:[%s3121_s24 + $0x150] sm:$0xff] %vm1356_vm2, %v1334_v22  ;;  %v874_v45 = vpop.xlane.xlu0 %873  ;;  %v2289_v21 = vpop.eup %2288  ;;  %v1337_v1 = vmul.f32 %v2370_v23, %v2287_v0  ;;  %v1089_v44 = vmax.f32 %v877_v15, 1e-24  ;;  %v2383_v0 = vld [vmem:[%s2526_s20 + $0x1c0] sm:$0xff] }
 0x23b   : > { %1464 = vst.msk [vmem:[%s3121_s24 + $0x150] sm:$0xff] %vm1421_vm3, %v2369_v31  ;;  %v1088_v28 = vmax.f32 %v874_v45, 1e-24  ;;  %v1336_v30 = vmul.f32 %v2371_v12, %v2289_v21  ;;  %v2382_v31 = vld [vmem:[%s2526_s20 + $0x1c8] sm:$0xff] }
 0x23c   : > { %1402 = vst.msk [vmem:[%s3121_s24 + $0x168] sm:$0xff] %vm1356_vm2, %v1337_v1  ;;  %2302 = vrsqrt.f32 %v1089_v44  ;;  %v2385_v44 = vld [vmem:[%s2526_s20 + $0x1d0] sm:$0xff] }
 0x23d   : > { %v2291_v51 = vpop.eup %2290  ;;  %1467 = vst.msk [vmem:[%s3121_s24 + $0x168] sm:$0xff] %vm1421_vm3, %v2370_v23  ;;  %2304 = vrsqrt.f32 %v1088_v28  ;;  %v883_v11 = vpop.xlane.xlu1 %882  ;;  %v2384_v23 = vld [vmem:[%s2526_s20 + $0x1d8] sm:$0xff] }
 0x23e   : > { %1401 = vst.msk [vmem:[%s3121_s24 + $0x160] sm:$0xff] %vm1356_vm2, %v1336_v30  ;;  %v880_v61 = vpop.xlane.xlu0 %879  ;;  %v2293_v29 = vpop.eup %2292  ;;  %v1339_v50 = vmul.f32 %v2372_v24, %v2291_v51  ;;  %v1091_v34 = vmax.f32 %v883_v11, 1e-24  ;;  %v2386_v51 = vld [vmem:[%s2526_s20 + $0x1e8] sm:$0xff] }
 0x23f   : > { %1466 = vst.msk [vmem:[%s3121_s24 + $0x160] sm:$0xff] %vm1421_vm3, %v2371_v12  ;;  %v1090_v20 = vmax.f32 %v880_v61, 1e-24  ;;  %v1338_v57 = vmul.f32 %v2373_v2, %v2293_v29  ;;  %v2387_v61 = vld [vmem:[%s2526_s20 + $0x1e0] sm:$0xff] }
 0x240   : > { %1404 = vst.msk [vmem:[%s3121_s24 + $0x178] sm:$0xff] %vm1356_vm2, %v1339_v50  ;;  %2306 = vrsqrt.f32 %v1091_v34  ;;  %v2388_v34 = vld [vmem:[%s2526_s20 + $0x1f8] sm:$0xff] }
 0x241   : > { %v2295_v7 = vpop.eup %2294  ;;  %1469 = vst.msk [vmem:[%s3121_s24 + $0x178] sm:$0xff] %vm1421_vm3, %v2372_v24  ;;  %2308 = vrsqrt.f32 %v1090_v20  ;;  %v889_v35 = vpop.xlane.xlu1 %888 }
 0x242   : > { %1403 = vst.msk [vmem:[%s3121_s24 + $0x170] sm:$0xff] %vm1356_vm2, %v1338_v57  ;;  %v886_v25 = vpop.xlane.xlu0 %885  ;;  %v2297_v56 = vpop.eup %2296  ;;  %v1341_v27 = vmul.f32 %v2374_v40, %v2295_v7  ;;  %v1093_v42 = vmax.f32 %v889_v35, 1e-24 }
 0x243   : > { %1468 = vst.msk [vmem:[%s3121_s24 + $0x170] sm:$0xff] %vm1421_vm3, %v2373_v2  ;;  %v1092_v63 = vmax.f32 %v886_v25, 1e-24  ;;  %v1340_v41 = vmul.f32 %v2375_v6, %v2297_v56  ;;  %v2389_v2 = vld [vmem:[%s2526_s20 + $0x1f0] sm:$0xff] }
 0x244   : > { %1406 = vst.msk [vmem:[%s3121_s24 + $0x188] sm:$0xff] %vm1356_vm2, %v1341_v27  ;;  %2310 = vrsqrt.f32 %v1093_v42 }
 0x245   : > { %v2299_v3 = vpop.eup %2298  ;;  %1471 = vst.msk [vmem:[%s3121_s24 + $0x188] sm:$0xff] %vm1421_vm3, %v2374_v40  ;;  %2312 = vrsqrt.f32 %v1092_v63  ;;  %v895_v62 = vpop.xlane.xlu1 %894 }
 0x246   : > { %1405 = vst.msk [vmem:[%s3121_s24 + $0x180] sm:$0xff] %vm1356_vm2, %v1340_v41  ;;  %v892_v46 = vpop.xlane.xlu0 %891  ;;  %v2301_v26 = vpop.eup %2300  ;;  %v1343_v19 = vmul.f32 %v2376_v8, %v2299_v3  ;;  %v1095_v43 = vmax.f32 %v895_v62, 1e-24 }
 0x247   : > { %1470 = vst.msk [vmem:[%s3121_s24 + $0x180] sm:$0xff] %vm1421_vm3, %v2375_v6  ;;  %v1094_v47 = vmax.f32 %v892_v46, 1e-24  ;;  %v1342_v18 = vmul.f32 %v2377_v4, %v2301_v26 }
 0x248   : > { %1408 = vst.msk [vmem:[%s3121_s24 + $0x198] sm:$0xff] %vm1356_vm2, %v1343_v19  ;;  %2314 = vrsqrt.f32 %v1095_v43 }
 0x249   : > { %v2303_v52 = vpop.eup %2302  ;;  %1473 = vst.msk [vmem:[%s3121_s24 + $0x198] sm:$0xff] %vm1421_vm3, %v2376_v8  ;;  %2316 = vrsqrt.f32 %v1094_v47  ;;  %v901_v33 = vpop.xlane.xlu1 %900 }
 0x24a   : > { %1407 = vst.msk [vmem:[%s3121_s24 + $0x190] sm:$0xff] %vm1356_vm2, %v1342_v18  ;;  %v898_v60 = vpop.xlane.xlu0 %897  ;;  %v2305_v37 = vpop.eup %2304  ;;  %v1345_v53 = vmul.f32 %v2378_v9, %v2303_v52  ;;  %v1097_v13 = vmax.f32 %v901_v33, 1e-24 }
 0x24b   : > { %1472 = vst.msk [vmem:[%s3121_s24 + $0x190] sm:$0xff] %vm1421_vm3, %v2377_v4  ;;  %v1096_v36 = vmax.f32 %v898_v60, 1e-24  ;;  %v1344_v32 = vmul.f32 %v2379_v58, %v2305_v37 }
 0x24c   : > { %1410 = vst.msk [vmem:[%s3121_s24 + $0x1a8] sm:$0xff] %vm1356_vm2, %v1345_v53  ;;  %2318 = vrsqrt.f32 %v1097_v13 }
 0x24d   : > { %v2307_v16 = vpop.eup %2306  ;;  %1475 = vst.msk [vmem:[%s3121_s24 + $0x1a8] sm:$0xff] %vm1421_vm3, %v2378_v9  ;;  %2320 = vrsqrt.f32 %v1096_v36  ;;  %v907_v55 = vpop.xlane.xlu1 %906 }
 0x24e   : > { %1409 = vst.msk [vmem:[%s3121_s24 + $0x1a0] sm:$0xff] %vm1356_vm2, %v1344_v32  ;;  %v904_v48 = vpop.xlane.xlu0 %903  ;;  %v2309_v59 = vpop.eup %2308  ;;  %v1347_v39 = vmul.f32 %v2380_v5, %v2307_v16  ;;  %v1099_v54 = vmax.f32 %v907_v55, 1e-24 }
 0x24f   : > { %1474 = vst.msk [vmem:[%s3121_s24 + $0x1a0] sm:$0xff] %vm1421_vm3, %v2379_v58  ;;  %v1098_v49 = vmax.f32 %v904_v48, 1e-24  ;;  %v1346_v17 = vmul.f32 %v2381_v10, %v2309_v59 }
 0x250   : > { %1412 = vst.msk [vmem:[%s3121_s24 + $0x1b8] sm:$0xff] %vm1356_vm2, %v1347_v39  ;;  %2322 = vrsqrt.f32 %v1099_v54 }
 0x251   : > { %v2311_v14 = vpop.eup %2310  ;;  %1477 = vst.msk [vmem:[%s3121_s24 + $0x1b8] sm:$0xff] %vm1421_vm3, %v2380_v5  ;;  %2324 = vrsqrt.f32 %v1098_v49 }
 0x252   : > { %1411 = vst.msk [vmem:[%s3121_s24 + $0x1b0] sm:$0xff] %vm1356_vm2, %v1346_v17  ;;  %v2313_v38 = vpop.eup %2312  ;;  %v1349_v22 = vmul.f32 %v2382_v31, %v2311_v14 }
 0x253   : > { %1476 = vst.msk [vmem:[%s3121_s24 + $0x1b0] sm:$0xff] %vm1421_vm3, %v2381_v10  ;;  %v1348_v15 = vmul.f32 %v2383_v0, %v2313_v38 }
 0x254   : > { %1414 = vst.msk [vmem:[%s3121_s24 + $0x1c8] sm:$0xff] %vm1356_vm2, %v1349_v22 }
 0x255   : > { %v2315_v45 = vpop.eup %2314  ;;  %1479 = vst.msk [vmem:[%s3121_s24 + $0x1c8] sm:$0xff] %vm1421_vm3, %v2382_v31 }
 0x256   : > { %1413 = vst.msk [vmem:[%s3121_s24 + $0x1c0] sm:$0xff] %vm1356_vm2, %v1348_v15  ;;  %v2317_v21 = vpop.eup %2316  ;;  %v1351_v1 = vmul.f32 %v2384_v23, %v2315_v45 }
 0x257   : > { %1478 = vst.msk [vmem:[%s3121_s24 + $0x1c0] sm:$0xff] %vm1421_vm3, %v2383_v0  ;;  %v1350_v28 = vmul.f32 %v2385_v44, %v2317_v21 }
 0x258   : > { %1416 = vst.msk [vmem:[%s3121_s24 + $0x1d8] sm:$0xff] %vm1356_vm2, %v1351_v1 }
 0x259   : > { %v2319_v12 = vpop.eup %2318  ;;  %1481 = vst.msk [vmem:[%s3121_s24 + $0x1d8] sm:$0xff] %vm1421_vm3, %v2384_v23 }
 0x25a   : > { %1415 = vst.msk [vmem:[%s3121_s24 + $0x1d0] sm:$0xff] %vm1356_vm2, %v1350_v28  ;;  %v2321_v30 = vpop.eup %2320  ;;  %v1353_v11 = vmul.f32 %v2386_v51, %v2319_v12 }
 0x25b   : > { %1480 = vst.msk [vmem:[%s3121_s24 + $0x1d0] sm:$0xff] %vm1421_vm3, %v2385_v44  ;;  %v1352_v29 = vmul.f32 %v2387_v61, %v2321_v30 }
 0x25c   : > { %1418 = vst.msk [vmem:[%s3121_s24 + $0x1e8] sm:$0xff] %vm1356_vm2, %v1353_v11 }
 0x25d   : > { %v2323_v24 = vpop.eup %2322  ;;  %1483 = vst.msk [vmem:[%s3121_s24 + $0x1e8] sm:$0xff] %vm1421_vm3, %v2386_v51 }
 0x25e   : > { %1417 = vst.msk [vmem:[%s3121_s24 + $0x1e0] sm:$0xff] %vm1356_vm2, %v1352_v29  ;;  %v2325_v50 = vpop.eup %2324  ;;  %v1355_v20 = vmul.f32 %v2388_v34, %v2323_v24 }
 0x25f   : > { %1482 = vst.msk [vmem:[%s3121_s24 + $0x1e0] sm:$0xff] %vm1421_vm3, %v2387_v61  ;;  %v1354_v57 = vmul.f32 %v2389_v2, %v2325_v50  ;;  %1492 = sbr.rel (!%p2514_p4) target bundleno = 676 (0x2a4), region = 28 }
 0x260   : > { %1420 = vst.msk [vmem:[%s3121_s24 + $0x1f8] sm:$0xff] %vm1356_vm2, %v1355_v20 }
 0x261   : > { %1485 = vst.msk [vmem:[%s3121_s24 + $0x1f8] sm:$0xff] %vm1421_vm3, %v2388_v34 }
 0x262   : > { %1419 = vst.msk [vmem:[%s3121_s24 + $0x1f0] sm:$0xff] %vm1356_vm2, %v1354_v57 }
 0x263   : > { %1484 = vst.msk [vmem:[%s3121_s24 + $0x1f0] sm:$0xff] %vm1421_vm3, %v2389_v2 }
 0x264   : > { %s4254_s25 = smov (!%p1495_p8, %s1494_s25), 64 }
 0x265   : > { %s1963_s30 = sshll.u32 %s4254_s25, 7 }
 0x266   : > { %p1966_p9 = scmp.eq.s32.totalorder %s1963_s30, 0 }
 0x267   : > { %s3824_s2 = sshrl.u32 (!%p1966_p9), %s4254_s25, 6 }
 0x268   : > { %1503 = sbr.rel (%p1966_p9) target bundleno = 676 (0x2a4), region = 32  ;;  %p1967_p10 = scmp.le.s32.totalorder (!%p1966_p9), %s3824_s2, 0 }
 0x26d   : > { %1910 = sbr.rel (%p1967_p10) target bundleno = 659 (0x293), region = 108  ;;  %s4245_s3 = smov (!%p1967_p10), %s3818_s29 }
 0x26e   : > { %s4246_s4 = smov (!%p1967_p10), %s3121_s24  ;;  %s3833_s5 = smov (!%p1967_p10), 0  }
 0x26f   : > { %s3835_s6 = smov (!%p1967_p10), 0  }
 0x272 LB: >> { %v1692_v7 = vld [vmem:[%s2452_s4] sm:$0xff]  ;;  %v1694_v35 = vld [vmem:[%s2452_s4 + $0x8] sm:$0xff]  ;;  %v1696_v25 = vld [vmem:[%s2452_s4 + $0x10] sm:$0xff]  ;;  %s1820_s8 = sadd.s32 1, %s2456_s5  ;;  %s1686_s6 = sadd.s32 1, %s2460_s6   ;;  %s2460_s6 = sphi %s3835_s6, %s1686_s6   ;;  %s2456_s5 = sphi %s3833_s5, %s4249_s5   ;;  %s2452_s4 = sphi %s4246_s4, %s4248_s4   ;;  %s2448_s3 = sphi %s4245_s3, %s4247_s3  }
 0x273   : >> { %1693 = vst [vmem:[%s2448_s3] sm:$0xff] %v1692_v7  ;;  %1695 = vst [vmem:[%s2448_s3 + $0x8] sm:$0xff] %v1694_v35  ;;  %v1698_v56 = vld [vmem:[%s2452_s4 + $0x18] sm:$0xff]  ;;  %v1700_v40 = vld [vmem:[%s2452_s4 + $0x20] sm:$0xff]  ;;  %p1821_p11 = scmp.ge.s32.totalorder %s1820_s8, %s3824_s2  ;;  %p1685_p12 = scmp.ge.s32.totalorder %s1686_s6, %s3824_s2 }
 0x274   : >> { %1697 = vst [vmem:[%s2448_s3 + $0x10] sm:$0xff] %v1696_v25  ;;  %v1702_v27 = vld [vmem:[%s2452_s4 + $0x28] sm:$0xff]  ;;  %1699 = vst [vmem:[%s2448_s3 + $0x18] sm:$0xff] %v1698_v56  ;;  %v1704_v42 = vld [vmem:[%s2452_s4 + $0x30] sm:$0xff] }
 0x275   : >> { %1701 = vst [vmem:[%s2448_s3 + $0x20] sm:$0xff] %v1700_v40  ;;  %1703 = vst [vmem:[%s2448_s3 + $0x28] sm:$0xff] %v1702_v27  ;;  %v1706_v63 = vld [vmem:[%s2452_s4 + $0x38] sm:$0xff]  ;;  %v1708_v6 = vld [vmem:[%s2452_s4 + $0x40] sm:$0xff]  ;;  %s4256_s8 = smov (%p1821_p11, %s1820_s8), 0 }
 0x276   : >> { %1705 = vst [vmem:[%s2448_s3 + $0x30] sm:$0xff] %v1704_v42  ;;  %1707 = vst [vmem:[%s2448_s3 + $0x38] sm:$0xff] %v1706_v63  ;;  %v1710_v41 = vld [vmem:[%s2452_s4 + $0x48] sm:$0xff]  ;;  %v1712_v3 = vld [vmem:[%s2452_s4 + $0x50] sm:$0xff]  ;;  %s1968_s9 = sshll.u32 %s4256_s8, 9  ;;  %s4249_s5 = smov %s4256_s8 }
 0x277   : >> { %1709 = vst [vmem:[%s2448_s3 + $0x40] sm:$0xff] %v1708_v6  ;;  %v1714_v62 = vld [vmem:[%s2452_s4 + $0x58] sm:$0xff]  ;;  %1711 = vst [vmem:[%s2448_s3 + $0x48] sm:$0xff] %v1710_v41  ;;  %v1716_v46 = vld [vmem:[%s2452_s4 + $0x60] sm:$0xff]  ;;  %s3891_s11 = scalar_lea.vmem %s3121_s24, %s1968_s9 [#allocation2]   ;;  %s3894_s12 = scalar_lea.vmem %s3818_s29, %s1968_s9  }
 0x278   : >> { %1713 = vst [vmem:[%s2448_s3 + $0x50] sm:$0xff] %v1712_v3  ;;  %1715 = vst [vmem:[%s2448_s3 + $0x58] sm:$0xff] %v1714_v62  ;;  %v1718_v26 = vld [vmem:[%s2452_s4 + $0x68] sm:$0xff]  ;;  %v1720_v8 = vld [vmem:[%s2452_s4 + $0x70] sm:$0xff] }
 0x279   : >> { %1717 = vst [vmem:[%s2448_s3 + $0x60] sm:$0xff] %v1716_v46  ;;  %1719 = vst [vmem:[%s2448_s3 + $0x68] sm:$0xff] %v1718_v26  ;;  %v1722_v19 = vld [vmem:[%s2452_s4 + $0x78] sm:$0xff]  ;;  %v1724_v43 = vld [vmem:[%s2452_s4 + $0x80] sm:$0xff] }
 0x27a   : >> { %1721 = vst [vmem:[%s2448_s3 + $0x70] sm:$0xff] %v1720_v8  ;;  %v1726_v47 = vld [vmem:[%s2452_s4 + $0x88] sm:$0xff]  ;;  %1723 = vst [vmem:[%s2448_s3 + $0x78] sm:$0xff] %v1722_v19  ;;  %v1728_v4 = vld [vmem:[%s2452_s4 + $0x90] sm:$0xff] }
 0x27b   : >> { %1725 = vst [vmem:[%s2448_s3 + $0x80] sm:$0xff] %v1724_v43  ;;  %1727 = vst [vmem:[%s2448_s3 + $0x88] sm:$0xff] %v1726_v47  ;;  %v1730_v18 = vld [vmem:[%s2452_s4 + $0x98] sm:$0xff]  ;;  %v1732_v52 = vld [vmem:[%s2452_s4 + $0xa0] sm:$0xff] }
 0x27c   : >> { %1729 = vst [vmem:[%s2448_s3 + $0x90] sm:$0xff] %v1728_v4  ;;  %1731 = vst [vmem:[%s2448_s3 + $0x98] sm:$0xff] %v1730_v18  ;;  %v1734_v33 = vld [vmem:[%s2452_s4 + $0xa8] sm:$0xff]  ;;  %v1736_v60 = vld [vmem:[%s2452_s4 + $0xb0] sm:$0xff] }
 0x27d   : >> { %1733 = vst [vmem:[%s2448_s3 + $0xa0] sm:$0xff] %v1732_v52  ;;  %v1738_v37 = vld [vmem:[%s2452_s4 + $0xb8] sm:$0xff]  ;;  %1735 = vst [vmem:[%s2448_s3 + $0xa8] sm:$0xff] %v1734_v33  ;;  %v1740_v9 = vld [vmem:[%s2452_s4 + $0xc0] sm:$0xff] }
 0x27e   : >> { %1737 = vst [vmem:[%s2448_s3 + $0xb0] sm:$0xff] %v1736_v60  ;;  %1739 = vst [vmem:[%s2448_s3 + $0xb8] sm:$0xff] %v1738_v37  ;;  %v1742_v53 = vld [vmem:[%s2452_s4 + $0xc8] sm:$0xff]  ;;  %v1744_v13 = vld [vmem:[%s2452_s4 + $0xd0] sm:$0xff] }
 0x27f   : >> { %1741 = vst [vmem:[%s2448_s3 + $0xc0] sm:$0xff] %v1740_v9  ;;  %1743 = vst [vmem:[%s2448_s3 + $0xc8] sm:$0xff] %v1742_v53  ;;  %v1746_v36 = vld [vmem:[%s2452_s4 + $0xd8] sm:$0xff]  ;;  %v1748_v58 = vld [vmem:[%s2452_s4 + $0xe0] sm:$0xff] }
 0x280   : >> { %1745 = vst [vmem:[%s2448_s3 + $0xd0] sm:$0xff] %v1744_v13  ;;  %v1750_v32 = vld [vmem:[%s2452_s4 + $0xe8] sm:$0xff]  ;;  %1747 = vst [vmem:[%s2448_s3 + $0xd8] sm:$0xff] %v1746_v36  ;;  %v1752_v16 = vld [vmem:[%s2452_s4 + $0xf0] sm:$0xff] }
 0x281   : >> { %1749 = vst [vmem:[%s2448_s3 + $0xe0] sm:$0xff] %v1748_v58  ;;  %1751 = vst [vmem:[%s2448_s3 + $0xe8] sm:$0xff] %v1750_v32  ;;  %v1754_v55 = vld [vmem:[%s2452_s4 + $0xf8] sm:$0xff]  ;;  %v1756_v48 = vld [vmem:[%s2452_s4 + $0x100] sm:$0xff] }
 0x282   : >> { %1753 = vst [vmem:[%s2448_s3 + $0xf0] sm:$0xff] %v1752_v16  ;;  %1755 = vst [vmem:[%s2448_s3 + $0xf8] sm:$0xff] %v1754_v55  ;;  %v1758_v59 = vld [vmem:[%s2452_s4 + $0x108] sm:$0xff]  ;;  %v1760_v5 = vld [vmem:[%s2452_s4 + $0x110] sm:$0xff] }
 0x283   : >> { %1757 = vst [vmem:[%s2448_s3 + $0x100] sm:$0xff] %v1756_v48  ;;  %v1762_v39 = vld [vmem:[%s2452_s4 + $0x118] sm:$0xff]  ;;  %1759 = vst [vmem:[%s2448_s3 + $0x108] sm:$0xff] %v1758_v59  ;;  %v1764_v54 = vld [vmem:[%s2452_s4 + $0x120] sm:$0xff] }
 0x284   : >> { %1761 = vst [vmem:[%s2448_s3 + $0x110] sm:$0xff] %v1760_v5  ;;  %1763 = vst [vmem:[%s2448_s3 + $0x118] sm:$0xff] %v1762_v39  ;;  %v1766_v49 = vld [vmem:[%s2452_s4 + $0x128] sm:$0xff]  ;;  %v1768_v10 = vld [vmem:[%s2452_s4 + $0x130] sm:$0xff] }
 0x285   : >> { %1765 = vst [vmem:[%s2448_s3 + $0x120] sm:$0xff] %v1764_v54  ;;  %1767 = vst [vmem:[%s2448_s3 + $0x128] sm:$0xff] %v1766_v49  ;;  %v1770_v17 = vld [vmem:[%s2452_s4 + $0x138] sm:$0xff]  ;;  %v1772_v14 = vld [vmem:[%s2452_s4 + $0x140] sm:$0xff] }
 0x286   : >> { %1769 = vst [vmem:[%s2448_s3 + $0x130] sm:$0xff] %v1768_v10  ;;  %v1774_v38 = vld [vmem:[%s2452_s4 + $0x148] sm:$0xff]  ;;  %1771 = vst [vmem:[%s2448_s3 + $0x138] sm:$0xff] %v1770_v17  ;;  %v1776_v31 = vld [vmem:[%s2452_s4 + $0x150] sm:$0xff] }
 0x287   : >> { %1773 = vst [vmem:[%s2448_s3 + $0x140] sm:$0xff] %v1772_v14  ;;  %1775 = vst [vmem:[%s2448_s3 + $0x148] sm:$0xff] %v1774_v38  ;;  %v1778_v22 = vld [vmem:[%s2452_s4 + $0x158] sm:$0xff]  ;;  %v1780_v0 = vld [vmem:[%s2452_s4 + $0x160] sm:$0xff] }
 0x288   : >> { %1777 = vst [vmem:[%s2448_s3 + $0x150] sm:$0xff] %v1776_v31  ;;  %1779 = vst [vmem:[%s2448_s3 + $0x158] sm:$0xff] %v1778_v22  ;;  %v1782_v15 = vld [vmem:[%s2452_s4 + $0x168] sm:$0xff]  ;;  %v1784_v45 = vld [vmem:[%s2452_s4 + $0x170] sm:$0xff] }
 0x289   : >> { %1781 = vst [vmem:[%s2448_s3 + $0x160] sm:$0xff] %v1780_v0  ;;  %v1786_v21 = vld [vmem:[%s2452_s4 + $0x178] sm:$0xff]  ;;  %1783 = vst [vmem:[%s2448_s3 + $0x168] sm:$0xff] %v1782_v15  ;;  %v1788_v23 = vld [vmem:[%s2452_s4 + $0x180] sm:$0xff] }
 0x28a   : >> { %1785 = vst [vmem:[%s2448_s3 + $0x170] sm:$0xff] %v1784_v45  ;;  %1787 = vst [vmem:[%s2448_s3 + $0x178] sm:$0xff] %v1786_v21  ;;  %v1790_v1 = vld [vmem:[%s2452_s4 + $0x188] sm:$0xff]  ;;  %v1792_v44 = vld [vmem:[%s2452_s4 + $0x190] sm:$0xff] }
 0x28b   : >> { %1789 = vst [vmem:[%s2448_s3 + $0x180] sm:$0xff] %v1788_v23  ;;  %1791 = vst [vmem:[%s2448_s3 + $0x188] sm:$0xff] %v1790_v1  ;;  %v1794_v28 = vld [vmem:[%s2452_s4 + $0x198] sm:$0xff]  ;;  %v1796_v12 = vld [vmem:[%s2452_s4 + $0x1a0] sm:$0xff] }
 0x28c   : >> { %1793 = vst [vmem:[%s2448_s3 + $0x190] sm:$0xff] %v1792_v44  ;;  %v1798_v30 = vld [vmem:[%s2452_s4 + $0x1a8] sm:$0xff]  ;;  %1795 = vst [vmem:[%s2448_s3 + $0x198] sm:$0xff] %v1794_v28  ;;  %v1800_v51 = vld [vmem:[%s2452_s4 + $0x1b0] sm:$0xff] }
 0x28d   : >> { %1797 = vst [vmem:[%s2448_s3 + $0x1a0] sm:$0xff] %v1796_v12  ;;  %1799 = vst [vmem:[%s2448_s3 + $0x1a8] sm:$0xff] %v1798_v30  ;;  %v1802_v11 = vld [vmem:[%s2452_s4 + $0x1b8] sm:$0xff]  ;;  %v1804_v61 = vld [vmem:[%s2452_s4 + $0x1c0] sm:$0xff] }
 0x28e   : >> { %1801 = vst [vmem:[%s2448_s3 + $0x1b0] sm:$0xff] %v1800_v51  ;;  %1803 = vst [vmem:[%s2448_s3 + $0x1b8] sm:$0xff] %v1802_v11  ;;  %v1806_v29 = vld [vmem:[%s2452_s4 + $0x1c8] sm:$0xff]  ;;  %v1808_v24 = vld [vmem:[%s2452_s4 + $0x1d0] sm:$0xff]  ;;  %1688 = sbr.rel (!%p1685_p12) target bundleno = 626 (0x272), region = 114 }
 0x28f   : >> { %1805 = vst [vmem:[%s2448_s3 + $0x1c0] sm:$0xff] %v1804_v61  ;;  %v1810_v50 = vld [vmem:[%s2452_s4 + $0x1d8] sm:$0xff]  ;;  %1807 = vst [vmem:[%s2448_s3 + $0x1c8] sm:$0xff] %v1806_v29  ;;  %v1812_v34 = vld [vmem:[%s2452_s4 + $0x1e0] sm:$0xff] }
 0x290   : >> { %1809 = vst [vmem:[%s2448_s3 + $0x1d0] sm:$0xff] %v1808_v24  ;;  %1811 = vst [vmem:[%s2448_s3 + $0x1d8] sm:$0xff] %v1810_v50  ;;  %v1814_v20 = vld [vmem:[%s2452_s4 + $0x1e8] sm:$0xff]  ;;  %v1816_v2 = vld [vmem:[%s2452_s4 + $0x1f0] sm:$0xff] }
 0x291   : >> { %1813 = vst [vmem:[%s2448_s3 + $0x1e0] sm:$0xff] %v1812_v34  ;;  %1815 = vst [vmem:[%s2448_s3 + $0x1e8] sm:$0xff] %v1814_v20  ;;  %v1818_v57 = vld [vmem:[%s2452_s4 + $0x1f8] sm:$0xff]  ;;  %s4248_s4 = smov %s3891_s11 }
 0x292   : >> { %1817 = vst [vmem:[%s2448_s3 + $0x1f0] sm:$0xff] %v1816_v2  ;;  %1819 = vst [vmem:[%s2448_s3 + $0x1f8] sm:$0xff] %v1818_v57  ;;  %s4247_s3 = smov %s3894_s12 }
 0x293 PF: > { %s3999_s14 = sand.u32 63, %s4254_s25   ;;  %s1979_s15 = sshll.u32 %s3824_s2, 9 }
 0x294   : > { %s1831_s16 = scalar_lea.vmem %s3121_s24, %s1979_s15 [#allocation2]   ;;  %s1833_s17 = scalar_lea.vmem %s3818_s29, %s1979_s15  }
 0x295   : > { %p1973_p13 = scmp.le.s32.totalorder %s3999_s14, 0 }
 0x296   : > { %s2462_s18 = smov (!%p1973_p13), %s1833_s17   ;;  %s2466_s19 = smov (!%p1973_p13), %s1831_s16  }
 0x297   : > { %1924 = sbr.rel (%p1973_p13) target bundleno = 676 (0x2a4), region = 119  ;;  %s2470_s20 = smov (!%p1973_p13), 0  }
 0x298   : > { %s2474_s21 = smov (!%p1973_p13), 0  }
 0x29c LB: >> { %v1843_v7 = vld [vmem:[%s2468_s19] sm:$0xff]  ;;  %s1845_s22 = sadd.s32 1, %s2472_s20  ;;  %s1837_s21 = sadd.s32 1, %s2476_s21   ;;  %s2476_s21 = sphi %s2474_s21, %s1837_s21   ;;  %s2472_s20 = sphi %s2470_s20, %s2471_s20   ;;  %s2468_s19 = sphi %s2466_s19, %s1850_s19   ;;  %s2464_s18 = sphi %s2462_s18, %s1851_s18  }
 0x29d   : >> { %1844 = vst [vmem:[%s2464_s18] sm:$0xff] %v1843_v7  ;;  %p1846_p0 = scmp.ge.s32.totalorder %s1845_s22, %s3999_s14  ;;  %p1836_p1 = scmp.ge.s32.totalorder %s1837_s21, %s3999_s14 }
 0x29f   : >> { %s4258_s22 = smov (%p1846_p0, %s1845_s22), 0  ;;  %1839 = sbr.rel (!%p1836_p1) target bundleno = 668 (0x29c), region = 125 }
 0x2a0   : >> { %s1974_s23 = sshll.u32 %s4258_s22, 3  ;;  %s2471_s20 = smov %s4258_s22  }
 0x2a1   : >> { %s1850_s19 = scalar_lea.vmem %s1831_s16, %s1974_s23 [#allocation2]   ;;  %s1851_s18 = scalar_lea.vmem %s1833_s17, %s1974_s23  }
 0x2a4 PF: > { %p8_p2 = scmp.ge.s32.totalorder %s2504_s10, 5   ;;  %s4250_s6 = smov %s2440_s7 }
 0x2a5   : > { %s4251_s7 = smov %s2512_s13  ;;  %s4252_s8 = smov %s2504_s10 }
 0x2a6   :  { %10 = sbr.rel (!%p8_p2) target bundleno = 2 (0x2), region = 136 }

</bundles_post_ra>
